<compile_context>
chip_gen: v5e
topology: v5e:2x2
jax: 0.10.0
libtpu: 0.0.40
codegen_flags: <defaults>
</compile_context>

<pallas_src>
import jax
import jax.numpy as jnp
from jax.experimental import pallas as pl
from jax.experimental.pallas import tpu as pltpu

# ----------------------------- model dims -----------------------------------
BATCH = 2
SEQ = 8
INPUT_SIZE = 16
HIDDEN = 32
NHEAD = 4
NUM_LAYERS = 2
DFF = 32
OUTPUT_SIZE = 4
HEAD_DIM = HIDDEN // NHEAD
LN_EPS = 1e-5
LANES = 128


def _layer_norm(x, w, b, eps=LN_EPS):
    mu = jnp.mean(x, axis=-1, keepdims=True)
    xc = x - mu
    var = jnp.mean(xc * xc, axis=-1, keepdims=True)
    return xc * jax.lax.rsqrt(var + eps) * w + b


# ----------------------- host-side parameter packing -------------------------
def pack_params(p):
    """Pack every weight/bias into one lane-dense f32[rows, 128] slab (one DMA).

    Each block is padded to an 8-row boundary so all in-kernel static slices are
    sublane-tile aligned (unmasked vector loads)."""
    scale = 1.0 / (HEAD_DIM ** 0.5)
    blocks, offsets = [], {}
    row = 0

    def add(name, arr):
        nonlocal row
        arr = jnp.asarray(arr, jnp.float32)
        r, c = arr.shape
        offsets[name] = row
        rpad = (-r) % 8                       # sublane-tile alignment
        blocks.append(jnp.pad(arr, ((0, rpad), (0, LANES - c))))
        row += r + rpad

    add("emb_w", p["emb_w"])
    add("emb_b", p["emb_b"])
    for l in range(NUM_LAYERS):
        # fused QKV weight/bias; softmax scale folded into the Q part at pack time
        add(f"wqkv{l}", jnp.concatenate(
            [p["qw"][l] * scale, p["kw"][l], p["vw"][l]], axis=1))      # (H, 3H)
        add(f"bqkv{l}", jnp.concatenate(
            [p["qb"][l] * scale, p["kb"][l], p["vb"][l]], axis=1))      # (1, 3H)
        add(f"ow{l}", p["ow"][l])
        add(f"ob{l}", p["ob"][l])
        add(f"l1w{l}", p["l1w"][l])
        add(f"l1b{l}", p["l1b"][l])
        add(f"l2w{l}", p["l2w"][l])
        add(f"l2b{l}", p["l2b"][l])
        add(f"ln1w{l}", p["ln1w"][l])
        add(f"ln1b{l}", p["ln1b"][l])
        add(f"ln2w{l}", p["ln2w"][l])
        add(f"ln2b{l}", p["ln2b"][l])
    add("fw", p["fw"])   # (H, O) -> zero-padded to 128 lanes (lane-dense head)
    add("fb", p["fb"])
    blob = jnp.concatenate(blocks, axis=0)
    return blob, offsets


# ------------------------------ Pallas kernel --------------------------------
def make_kernel(offsets):
    B, S, F, H, HD, NH = BATCH, SEQ, INPUT_SIZE, HIDDEN, HEAD_DIM, NHEAD

    def kernel(x_ref, p_ref, out_ref):
        def par(name, rows, cols):
            r = offsets[name]                        # static, 8-row-aligned offset
            return p_ref[r:r + rows, 0:cols]         # static slice of the param slab

        x = x_ref[...]                                                  # (B*S, F)
        h = jnp.dot(x, par("emb_w", F, H),
                    preferred_element_type=jnp.float32) + par("emb_b", 1, H)

        for l in range(NUM_LAYERS):
            # ---- fused QKV projection: one (B*S, H) x (H, 3H) MXU push ----
            qkv = jnp.dot(h, par(f"wqkv{l}", H, 3 * H),
                          preferred_element_type=jnp.float32) + par(f"bqkv{l}", 1, 3 * H)

            # ---- head-batched attention over g = batch * NHEAD + head ----
            q_parts, k_parts, v_parts = [], [], []
            for b in range(B):
                rows = qkv[b * S:(b + 1) * S]                           # (S, 3H)
                for n in range(NH):
                    q_parts.append(rows[:, n * HD:(n + 1) * HD])
                    k_parts.append(rows[:, H + n * HD:H + (n + 1) * HD])
                    v_parts.append(rows[:, 2 * H + n * HD:2 * H + (n + 1) * HD])
            qg = jnp.stack(q_parts, axis=0)                             # (B*NH, S, HD)
            kg = jnp.stack(k_parts, axis=0)
            vg = jnp.stack(v_parts, axis=0)

            s = jnp.einsum('gqd,gkd->gqk', qg, kg,
                           preferred_element_type=jnp.float32)          # (B*NH, S, S)
            s = s - jnp.max(s, axis=-1, keepdims=True)
            pexp = jnp.exp(s)
            pexp = pexp * pl.reciprocal(jnp.sum(pexp, axis=-1, keepdims=True),
                                        approx=True)
            ctx = jnp.einsum('gqk,gkd->gqd', pexp, vg,
                             preferred_element_type=jnp.float32)        # (B*NH, S, HD)

            # per-head output projection, heads summed (no lane-axis concatenate)
            ow_heads = par(f"ow{l}", H, H).reshape(NH, HD, H)           # (NH, HD, H)
            attn_rows = []
            for b in range(B):
                proj = jnp.einsum('nqd,ndh->nqh', ctx[b * NH:(b + 1) * NH], ow_heads,
                                  preferred_element_type=jnp.float32)   # (NH, S, H)
                attn_rows.append(jnp.sum(proj, axis=0))                 # (S, H)
            attn = jnp.concatenate(attn_rows, axis=0) + par(f"ob{l}", 1, H)

            # TODO(synk): dropout layers are identity (eval-mode semantics).
            h = _layer_norm(h + attn, par(f"ln1w{l}", 1, H), par(f"ln1b{l}", 1, H))

            # ---- feed-forward (ReLU) ----
            ff = jnp.maximum(
                jnp.dot(h, par(f"l1w{l}", H, DFF),
                        preferred_element_type=jnp.float32) + par(f"l1b{l}", 1, DFF),
                0.0)
            ff = jnp.dot(ff, par(f"l2w{l}", DFF, H),
                         preferred_element_type=jnp.float32) + par(f"l2b{l}", 1, H)
            h = _layer_norm(h + ff, par(f"ln2w{l}", 1, H), par(f"ln2b{l}", 1, H))

        # lane-dense single store: (B*S, 128); logits occupy lanes 0:OUTPUT_SIZE.
        out_ref[...] = jnp.dot(h, par("fw", H, LANES),
                               preferred_element_type=jnp.float32) + par("fb", 1, LANES)

    return kernel


def transformer_policy_forward(x, blob, offsets):
    B, S, F = x.shape
    x2 = x.reshape(B * S, F)                      # fold batch in the wrapper (free)
    vmem = pl.BlockSpec(memory_space=pltpu.MemorySpace.VMEM)
    out = pl.pallas_call(
        make_kernel(offsets),
        out_shape=jax.ShapeDtypeStruct((B * S, LANES), jnp.float32),
        in_specs=[vmem, vmem],
        out_specs=vmem,
    )(x2, blob)
    # last token of each sequence, first OUTPUT_SIZE lanes -> (B, O) logits
    return out.reshape(B, S, LANES)[:, -1, :OUTPUT_SIZE]


# --------------------------- deterministic params ----------------------------
def init_params(key):
    keys = jax.random.split(key, 16)
    p = {}
    p["emb_w"] = 0.05 * jax.random.normal(keys[0], (INPUT_SIZE, HIDDEN), jnp.float32)
    p["emb_b"] = 0.01 * jax.random.normal(keys[1], (1, HIDDEN), jnp.float32)

    L, H, D = NUM_LAYERS, HIDDEN, DFF
    p["qw"] = 0.05 * jax.random.normal(keys[2], (L, H, H), jnp.float32)
    p["kw"] = 0.05 * jax.random.normal(keys[3], (L, H, H), jnp.float32)
    p["vw"] = 0.05 * jax.random.normal(keys[4], (L, H, H), jnp.float32)
    p["qb"] = 0.01 * jax.random.normal(keys[5], (L, 1, H), jnp.float32)
    p["kb"] = 0.01 * jax.random.normal(keys[6], (L, 1, H), jnp.float32)
    p["vb"] = 0.01 * jax.random.normal(keys[7], (L, 1, H), jnp.float32)
    p["ow"] = 0.05 * jax.random.normal(keys[8], (L, H, H), jnp.float32)
    p["ob"] = 0.01 * jax.random.normal(keys[9], (L, 1, H), jnp.float32)
    p["l1w"] = 0.05 * jax.random.normal(keys[10], (L, H, D), jnp.float32)
    p["l1b"] = 0.01 * jax.random.normal(keys[11], (L, 1, D), jnp.float32)
    p["l2w"] = 0.05 * jax.random.normal(keys[12], (L, D, H), jnp.float32)
    p["l2b"] = 0.01 * jax.random.normal(keys[13], (L, 1, H), jnp.float32)
    p["ln1w"] = jnp.ones((L, 1, H), jnp.float32)
    p["ln1b"] = jnp.zeros((L, 1, H), jnp.float32)
    p["ln2w"] = jnp.ones((L, 1, H), jnp.float32)
    p["ln2b"] = jnp.zeros((L, 1, H), jnp.float32)
    p["fw"] = 0.05 * jax.random.normal(keys[14], (HIDDEN, OUTPUT_SIZE), jnp.float32)
    p["fb"] = 0.01 * jax.random.normal(keys[15], (1, OUTPUT_SIZE), jnp.float32)
    return p


# ------------------------------ pure-JAX reference ---------------------------
def reference_forward(x, p):
    scale = 1.0 / (HEAD_DIM ** 0.5)
    h = x @ p["emb_w"] + p["emb_b"]                                    # (B,S,H)
    B, S, H = h.shape
    for l in range(NUM_LAYERS):
        q = h @ p["qw"][l] + p["qb"][l]
        k = h @ p["kw"][l] + p["kb"][l]
        v = h @ p["vw"][l] + p["vb"][l]
        qh = q.reshape(B, S, NHEAD, HEAD_DIM).transpose(0, 2, 1, 3) * scale
        kh = k.reshape(B, S, NHEAD, HEAD_DIM).transpose(0, 2, 1, 3)
        vh = v.reshape(B, S, NHEAD, HEAD_DIM).transpose(0, 2, 1, 3)
        s = jnp.einsum('bhqd,bhkd->bhqk', qh, kh)
        pr = jax.nn.softmax(s, axis=-1)
        a = jnp.einsum('bhqk,bhkd->bhqd', pr, vh).transpose(0, 2, 1, 3).reshape(B, S, H)
        a = a @ p["ow"][l] + p["ob"][l]
        h = _layer_norm(h + a, p["ln1w"][l], p["ln1b"][l])
        ff = jnp.maximum(h @ p["l1w"][l] + p["l1b"][l], 0.0)
        ff = ff @ p["l2w"][l] + p["l2b"][l]
        h = _layer_norm(h + ff, p["ln2w"][l], p["ln2b"][l])
    return h[:, -1, :] @ p["fw"] + p["fb"]


# ----------------------------------- main -------------------------------------
if __name__ == "__main__":
    key = jax.random.PRNGKey(0)
    k_x, k_p = jax.random.split(key)
    x = jax.random.normal(k_x, (BATCH, SEQ, INPUT_SIZE), jnp.float32)
    params = init_params(k_p)
    blob, offsets = pack_params(params)

    logits = transformer_policy_forward(x, blob, offsets)
    logits = jax.block_until_ready(logits)

    ref = reference_forward(x, params)
    assert logits.shape == (BATCH, OUTPUT_SIZE)
    # slightly looser tolerance: softmax denom uses the EUP approximate reciprocal
    # (pl.reciprocal(approx=True)).
    assert jnp.allclose(logits, ref, atol=2e-2, rtol=2e-2), (logits, ref)

    # Categorical(logits=logits) is fully determined by these logits.
    _ = jax.nn.softmax(logits, axis=-1)
    print("KERNEL_OK")
</pallas_src>

<mosaic_0001>
module attributes {stable_mosaic.version = 11 : i64} {
  func.func @kernel(%arg0: memref<16x16xf32, #tpu.memory_space<vmem>>, %arg1: memref<448x128xf32, #tpu.memory_space<vmem>>, %arg2: memref<16x128xf32, #tpu.memory_space<vmem>>) attributes {dimension_semantics = [], scalar_prefetch = 0 : i64, scratch_operands = 0 : i64, tpu.core_type = #tpu.core_type<tc>} {
    %c0 = arith.constant 0 : index
    %c0_0 = arith.constant 0 : index
    %0 = vector.load %arg0[%c0, %c0_0] : memref<16x16xf32, #tpu.memory_space<vmem>>, vector<16x16xf32>
    %c0_1 = arith.constant 0 : index
    %c0_2 = arith.constant 0 : index
    %1 = vector.load %arg1[%c0_1, %c0_2] : memref<448x128xf32, #tpu.memory_space<vmem>>, vector<16x32xf32>
    %cst = arith.constant dense<0.000000e+00> : vector<16x32xf32>
    %2 = tpu.matmul %0, %1, %cst {dimension_numbers = #tpu.dot_dimension_numbers<[1], [0], [0], [1], [0, 0, 1, 1], [], []>} : vector<16x16xf32>, vector<16x32xf32>, vector<16x32xf32> -> vector<16x32xf32>
    %c16 = arith.constant 16 : index
    %c0_3 = arith.constant 0 : index
    %3 = vector.load %arg1[%c16, %c0_3] : memref<448x128xf32, #tpu.memory_space<vmem>>, vector<1x32xf32>
    %4 = vector.broadcast %3 : vector<1x32xf32> to vector<16x32xf32>
    %5 = arith.addf %2, %4 : vector<16x32xf32>
    %c24 = arith.constant 24 : index
    %c0_4 = arith.constant 0 : index
    %6 = vector.load %arg1[%c24, %c0_4] : memref<448x128xf32, #tpu.memory_space<vmem>>, vector<32x96xf32>
    %cst_5 = arith.constant dense<0.000000e+00> : vector<16x96xf32>
    %7 = tpu.matmul %5, %6, %cst_5 {dimension_numbers = #tpu.dot_dimension_numbers<[1], [0], [0], [1], [0, 0, 1, 1], [], []>} : vector<16x32xf32>, vector<32x96xf32>, vector<16x96xf32> -> vector<16x96xf32>
    %c56 = arith.constant 56 : index
    %c0_6 = arith.constant 0 : index
    %8 = vector.load %arg1[%c56, %c0_6] : memref<448x128xf32, #tpu.memory_space<vmem>>, vector<1x96xf32>
    %9 = vector.broadcast %8 : vector<1x96xf32> to vector<16x96xf32>
    %10 = arith.addf %7, %9 : vector<16x96xf32>
    %11 = vector.extract_strided_slice %10 {offsets = [0, 0], sizes = [8, 96], strides = [1, 1]} : vector<16x96xf32> to vector<8x96xf32>
    %12 = vector.extract_strided_slice %11 {offsets = [0, 0], sizes = [8, 8], strides = [1, 1]} : vector<8x96xf32> to vector<8x8xf32>
    %13 = vector.extract_strided_slice %11 {offsets = [0, 32], sizes = [8, 8], strides = [1, 1]} : vector<8x96xf32> to vector<8x8xf32>
    %14 = vector.extract_strided_slice %11 {offsets = [0, 64], sizes = [8, 8], strides = [1, 1]} : vector<8x96xf32> to vector<8x8xf32>
    %15 = vector.extract_strided_slice %11 {offsets = [0, 8], sizes = [8, 8], strides = [1, 1]} : vector<8x96xf32> to vector<8x8xf32>
    %16 = vector.extract_strided_slice %11 {offsets = [0, 40], sizes = [8, 8], strides = [1, 1]} : vector<8x96xf32> to vector<8x8xf32>
    %17 = vector.extract_strided_slice %11 {offsets = [0, 72], sizes = [8, 8], strides = [1, 1]} : vector<8x96xf32> to vector<8x8xf32>
    %18 = vector.extract_strided_slice %11 {offsets = [0, 16], sizes = [8, 8], strides = [1, 1]} : vector<8x96xf32> to vector<8x8xf32>
    %19 = vector.extract_strided_slice %11 {offsets = [0, 48], sizes = [8, 8], strides = [1, 1]} : vector<8x96xf32> to vector<8x8xf32>
    %20 = vector.extract_strided_slice %11 {offsets = [0, 80], sizes = [8, 8], strides = [1, 1]} : vector<8x96xf32> to vector<8x8xf32>
    %21 = vector.extract_strided_slice %11 {offsets = [0, 24], sizes = [8, 8], strides = [1, 1]} : vector<8x96xf32> to vector<8x8xf32>
    %22 = vector.extract_strided_slice %11 {offsets = [0, 56], sizes = [8, 8], strides = [1, 1]} : vector<8x96xf32> to vector<8x8xf32>
    %23 = vector.extract_strided_slice %11 {offsets = [0, 88], sizes = [8, 8], strides = [1, 1]} : vector<8x96xf32> to vector<8x8xf32>
    %24 = vector.extract_strided_slice %10 {offsets = [8, 0], sizes = [8, 96], strides = [1, 1]} : vector<16x96xf32> to vector<8x96xf32>
    %25 = vector.extract_strided_slice %24 {offsets = [0, 0], sizes = [8, 8], strides = [1, 1]} : vector<8x96xf32> to vector<8x8xf32>
    %26 = vector.extract_strided_slice %24 {offsets = [0, 32], sizes = [8, 8], strides = [1, 1]} : vector<8x96xf32> to vector<8x8xf32>
    %27 = vector.extract_strided_slice %24 {offsets = [0, 64], sizes = [8, 8], strides = [1, 1]} : vector<8x96xf32> to vector<8x8xf32>
    %28 = vector.extract_strided_slice %24 {offsets = [0, 8], sizes = [8, 8], strides = [1, 1]} : vector<8x96xf32> to vector<8x8xf32>
    %29 = vector.extract_strided_slice %24 {offsets = [0, 40], sizes = [8, 8], strides = [1, 1]} : vector<8x96xf32> to vector<8x8xf32>
    %30 = vector.extract_strided_slice %24 {offsets = [0, 72], sizes = [8, 8], strides = [1, 1]} : vector<8x96xf32> to vector<8x8xf32>
    %31 = vector.extract_strided_slice %24 {offsets = [0, 16], sizes = [8, 8], strides = [1, 1]} : vector<8x96xf32> to vector<8x8xf32>
    %32 = vector.extract_strided_slice %24 {offsets = [0, 48], sizes = [8, 8], strides = [1, 1]} : vector<8x96xf32> to vector<8x8xf32>
    %33 = vector.extract_strided_slice %24 {offsets = [0, 80], sizes = [8, 8], strides = [1, 1]} : vector<8x96xf32> to vector<8x8xf32>
    %34 = vector.extract_strided_slice %24 {offsets = [0, 24], sizes = [8, 8], strides = [1, 1]} : vector<8x96xf32> to vector<8x8xf32>
    %35 = vector.extract_strided_slice %24 {offsets = [0, 56], sizes = [8, 8], strides = [1, 1]} : vector<8x96xf32> to vector<8x8xf32>
    %36 = vector.extract_strided_slice %24 {offsets = [0, 88], sizes = [8, 8], strides = [1, 1]} : vector<8x96xf32> to vector<8x8xf32>
    %37 = vector.shape_cast %12 : vector<8x8xf32> to vector<1x8x8xf32>
    %38 = vector.shape_cast %15 : vector<8x8xf32> to vector<1x8x8xf32>
    %39 = vector.shape_cast %18 : vector<8x8xf32> to vector<1x8x8xf32>
    %40 = vector.shape_cast %21 : vector<8x8xf32> to vector<1x8x8xf32>
    %41 = vector.shape_cast %25 : vector<8x8xf32> to vector<1x8x8xf32>
    %42 = vector.shape_cast %28 : vector<8x8xf32> to vector<1x8x8xf32>
    %43 = vector.shape_cast %31 : vector<8x8xf32> to vector<1x8x8xf32>
    %44 = vector.shape_cast %34 : vector<8x8xf32> to vector<1x8x8xf32>
    %45 = tpu.concatenate %37, %38, %39, %40, %41, %42, %43, %44 in 0 : vector<1x8x8xf32>, vector<1x8x8xf32>, vector<1x8x8xf32>, vector<1x8x8xf32>, vector<1x8x8xf32>, vector<1x8x8xf32>, vector<1x8x8xf32>, vector<1x8x8xf32> -> vector<8x8x8xf32>
    %46 = vector.shape_cast %13 : vector<8x8xf32> to vector<1x8x8xf32>
    %47 = vector.shape_cast %16 : vector<8x8xf32> to vector<1x8x8xf32>
    %48 = vector.shape_cast %19 : vector<8x8xf32> to vector<1x8x8xf32>
    %49 = vector.shape_cast %22 : vector<8x8xf32> to vector<1x8x8xf32>
    %50 = vector.shape_cast %26 : vector<8x8xf32> to vector<1x8x8xf32>
    %51 = vector.shape_cast %29 : vector<8x8xf32> to vector<1x8x8xf32>
    %52 = vector.shape_cast %32 : vector<8x8xf32> to vector<1x8x8xf32>
    %53 = vector.shape_cast %35 : vector<8x8xf32> to vector<1x8x8xf32>
    %54 = tpu.concatenate %46, %47, %48, %49, %50, %51, %52, %53 in 0 : vector<1x8x8xf32>, vector<1x8x8xf32>, vector<1x8x8xf32>, vector<1x8x8xf32>, vector<1x8x8xf32>, vector<1x8x8xf32>, vector<1x8x8xf32>, vector<1x8x8xf32> -> vector<8x8x8xf32>
    %55 = vector.shape_cast %14 : vector<8x8xf32> to vector<1x8x8xf32>
    %56 = vector.shape_cast %17 : vector<8x8xf32> to vector<1x8x8xf32>
    %57 = vector.shape_cast %20 : vector<8x8xf32> to vector<1x8x8xf32>
    %58 = vector.shape_cast %23 : vector<8x8xf32> to vector<1x8x8xf32>
    %59 = vector.shape_cast %27 : vector<8x8xf32> to vector<1x8x8xf32>
    %60 = vector.shape_cast %30 : vector<8x8xf32> to vector<1x8x8xf32>
    %61 = vector.shape_cast %33 : vector<8x8xf32> to vector<1x8x8xf32>
    %62 = vector.shape_cast %36 : vector<8x8xf32> to vector<1x8x8xf32>
    %63 = tpu.concatenate %55, %56, %57, %58, %59, %60, %61, %62 in 0 : vector<1x8x8xf32>, vector<1x8x8xf32>, vector<1x8x8xf32>, vector<1x8x8xf32>, vector<1x8x8xf32>, vector<1x8x8xf32>, vector<1x8x8xf32>, vector<1x8x8xf32> -> vector<8x8x8xf32>
    "tpu.trace_start"() <{level = 10 : i32, message = "gqd,gkd->gqk"}> : () -> ()
    %cst_7 = arith.constant dense<0.000000e+00> : vector<8x8x8xf32>
    %64 = tpu.matmul %45, %54, %cst_7 {dimension_numbers = #tpu.dot_dimension_numbers<[2], [2], [1], [1], [0, 0, 0, 1, 1, 1], [0], [0]>} : vector<8x8x8xf32>, vector<8x8x8xf32>, vector<8x8x8xf32> -> vector<8x8x8xf32>
    "tpu.trace_stop"() : () -> ()
    %cst_8 = arith.constant dense<0xFF800000> : vector<8x8xf32>
    %65 = vector.multi_reduction <maximumf>, %64, %cst_8 [2] : vector<8x8x8xf32> to vector<8x8xf32>
    %66 = vector.shape_cast %65 : vector<8x8xf32> to vector<8x8x1xf32>
    %67 = vector.broadcast %66 : vector<8x8x1xf32> to vector<8x8x8xf32>
    %68 = arith.subf %64, %67 : vector<8x8x8xf32>
    %69 = math.exp %68 : vector<8x8x8xf32>
    %cst_9 = arith.constant dense<0.000000e+00> : vector<8x8xf32>
    %70 = vector.multi_reduction <add>, %69, %cst_9 [2] : vector<8x8x8xf32> to vector<8x8xf32>
    %71 = vector.shape_cast %70 : vector<8x8xf32> to vector<8x8x1xf32>
    %72 = tpu.reciprocal %71 {approx = true} : vector<8x8x1xf32> -> vector<8x8x1xf32>
    %73 = vector.broadcast %72 : vector<8x8x1xf32> to vector<8x8x8xf32>
    %74 = arith.mulf %69, %73 : vector<8x8x8xf32>
    "tpu.trace_start"() <{level = 10 : i32, message = "gqk,gkd->gqd"}> : () -> ()
    %cst_10 = arith.constant dense<0.000000e+00> : vector<8x8x8xf32>
    %75 = tpu.matmul %74, %63, %cst_10 {dimension_numbers = #tpu.dot_dimension_numbers<[2], [1], [1], [2], [0, 0, 0, 1, 1, 2], [0], [0]>} : vector<8x8x8xf32>, vector<8x8x8xf32>, vector<8x8x8xf32> -> vector<8x8x8xf32>
    "tpu.trace_stop"() : () -> ()
    %c64 = arith.constant 64 : index
    %c0_11 = arith.constant 0 : index
    %76 = vector.load %arg1[%c64, %c0_11] : memref<448x128xf32, #tpu.memory_space<vmem>>, vector<32x32xf32>
    %77 = vector.shape_cast %76 : vector<32x32xf32> to vector<4x8x32xf32>
    %78 = vector.extract_strided_slice %75 {offsets = [0, 0, 0], sizes = [4, 8, 8], strides = [1, 1, 1]} : vector<8x8x8xf32> to vector<4x8x8xf32>
    "tpu.trace_start"() <{level = 10 : i32, message = "nqd,ndh->nqh"}> : () -> ()
    %cst_12 = arith.constant dense<0.000000e+00> : vector<4x8x32xf32>
    %79 = tpu.matmul %78, %77, %cst_12 {dimension_numbers = #tpu.dot_dimension_numbers<[2], [1], [1], [2], [0, 0, 0, 1, 1, 2], [0], [0]>} : vector<4x8x8xf32>, vector<4x8x32xf32>, vector<4x8x32xf32> -> vector<4x8x32xf32>
    "tpu.trace_stop"() : () -> ()
    %cst_13 = arith.constant dense<0.000000e+00> : vector<8x32xf32>
    %80 = vector.multi_reduction <add>, %79, %cst_13 [0] : vector<4x8x32xf32> to vector<8x32xf32>
    %81 = vector.extract_strided_slice %75 {offsets = [4, 0, 0], sizes = [4, 8, 8], strides = [1, 1, 1]} : vector<8x8x8xf32> to vector<4x8x8xf32>
    "tpu.trace_start"() <{level = 10 : i32, message = "nqd,ndh->nqh"}> : () -> ()
    %cst_14 = arith.constant dense<0.000000e+00> : vector<4x8x32xf32>
    %82 = tpu.matmul %81, %77, %cst_14 {dimension_numbers = #tpu.dot_dimension_numbers<[2], [1], [1], [2], [0, 0, 0, 1, 1, 2], [0], [0]>} : vector<4x8x8xf32>, vector<4x8x32xf32>, vector<4x8x32xf32> -> vector<4x8x32xf32>
    "tpu.trace_stop"() : () -> ()
    %cst_15 = arith.constant dense<0.000000e+00> : vector<8x32xf32>
    %83 = vector.multi_reduction <add>, %82, %cst_15 [0] : vector<4x8x32xf32> to vector<8x32xf32>
    %84 = tpu.concatenate %80, %83 in 0 : vector<8x32xf32>, vector<8x32xf32> -> vector<16x32xf32>
    %c96 = arith.constant 96 : index
    %c0_16 = arith.constant 0 : index
    %85 = vector.load %arg1[%c96, %c0_16] : memref<448x128xf32, #tpu.memory_space<vmem>>, vector<1x32xf32>
    %86 = vector.broadcast %85 : vector<1x32xf32> to vector<16x32xf32>
    %87 = arith.addf %84, %86 : vector<16x32xf32>
    %88 = arith.addf %5, %87 : vector<16x32xf32>
    %c184 = arith.constant 184 : index
    %c0_17 = arith.constant 0 : index
    %89 = vector.load %arg1[%c184, %c0_17] : memref<448x128xf32, #tpu.memory_space<vmem>>, vector<1x32xf32>
    %c192 = arith.constant 192 : index
    %c0_18 = arith.constant 0 : index
    %90 = vector.load %arg1[%c192, %c0_18] : memref<448x128xf32, #tpu.memory_space<vmem>>, vector<1x32xf32>
    %cst_19 = arith.constant dense<0.000000e+00> : vector<16xf32>
    %91 = vector.multi_reduction <add>, %88, %cst_19 [1] : vector<16x32xf32> to vector<16xf32>
    %92 = vector.shape_cast %91 : vector<16xf32> to vector<16x1xf32>
    %cst_20 = arith.constant 3.200000e+01 : f32
    %93 = vector.broadcast %cst_20 : f32 to vector<16x1xf32>
    %94 = arith.divf %92, %93 : vector<16x1xf32>
    %95 = vector.broadcast %94 : vector<16x1xf32> to vector<16x32xf32>
    %96 = arith.subf %88, %95 : vector<16x32xf32>
    %97 = arith.mulf %96, %96 : vector<16x32xf32>
    %cst_21 = arith.constant dense<0.000000e+00> : vector<16xf32>
    %98 = vector.multi_reduction <add>, %97, %cst_21 [1] : vector<16x32xf32> to vector<16xf32>
    %99 = vector.shape_cast %98 : vector<16xf32> to vector<16x1xf32>
    %cst_22 = arith.constant 3.200000e+01 : f32
    %100 = vector.broadcast %cst_22 : f32 to vector<16x1xf32>
    %101 = arith.divf %99, %100 : vector<16x1xf32>
    %cst_23 = arith.constant 9.99999974E-6 : f32
    %102 = vector.broadcast %cst_23 : f32 to vector<16x1xf32>
    %103 = arith.addf %101, %102 : vector<16x1xf32>
    %104 = math.rsqrt %103 : vector<16x1xf32>
    %105 = vector.broadcast %104 : vector<16x1xf32> to vector<16x32xf32>
    %106 = arith.mulf %96, %105 : vector<16x32xf32>
    %107 = vector.broadcast %89 : vector<1x32xf32> to vector<16x32xf32>
    %108 = arith.mulf %106, %107 : vector<16x32xf32>
    %109 = vector.broadcast %90 : vector<1x32xf32> to vector<16x32xf32>
    %110 = arith.addf %108, %109 : vector<16x32xf32>
    %c104 = arith.constant 104 : index
    %c0_24 = arith.constant 0 : index
    %111 = vector.load %arg1[%c104, %c0_24] : memref<448x128xf32, #tpu.memory_space<vmem>>, vector<32x32xf32>
    %cst_25 = arith.constant dense<0.000000e+00> : vector<16x32xf32>
    %112 = tpu.matmul %110, %111, %cst_25 {dimension_numbers = #tpu.dot_dimension_numbers<[1], [0], [0], [1], [0, 0, 1, 1], [], []>} : vector<16x32xf32>, vector<32x32xf32>, vector<16x32xf32> -> vector<16x32xf32>
    %c136 = arith.constant 136 : index
    %c0_26 = arith.constant 0 : index
    %113 = vector.load %arg1[%c136, %c0_26] : memref<448x128xf32, #tpu.memory_space<vmem>>, vector<1x32xf32>
    %114 = vector.broadcast %113 : vector<1x32xf32> to vector<16x32xf32>
    %115 = arith.addf %112, %114 : vector<16x32xf32>
    %cst_27 = arith.constant 0.000000e+00 : f32
    %116 = vector.broadcast %cst_27 : f32 to vector<16x32xf32>
    %117 = arith.maximumf %115, %116 : vector<16x32xf32>
    %c144 = arith.constant 144 : index
    %c0_28 = arith.constant 0 : index
    %118 = vector.load %arg1[%c144, %c0_28] : memref<448x128xf32, #tpu.memory_space<vmem>>, vector<32x32xf32>
    %cst_29 = arith.constant dense<0.000000e+00> : vector<16x32xf32>
    %119 = tpu.matmul %117, %118, %cst_29 {dimension_numbers = #tpu.dot_dimension_numbers<[1], [0], [0], [1], [0, 0, 1, 1], [], []>} : vector<16x32xf32>, vector<32x32xf32>, vector<16x32xf32> -> vector<16x32xf32>
    %c176 = arith.constant 176 : index
    %c0_30 = arith.constant 0 : index
    %120 = vector.load %arg1[%c176, %c0_30] : memref<448x128xf32, #tpu.memory_space<vmem>>, vector<1x32xf32>
    %121 = vector.broadcast %120 : vector<1x32xf32> to vector<16x32xf32>
    %122 = arith.addf %119, %121 : vector<16x32xf32>
    %123 = arith.addf %110, %122 : vector<16x32xf32>
    %c200 = arith.constant 200 : index
    %c0_31 = arith.constant 0 : index
    %124 = vector.load %arg1[%c200, %c0_31] : memref<448x128xf32, #tpu.memory_space<vmem>>, vector<1x32xf32>
    %c208 = arith.constant 208 : index
    %c0_32 = arith.constant 0 : index
    %125 = vector.load %arg1[%c208, %c0_32] : memref<448x128xf32, #tpu.memory_space<vmem>>, vector<1x32xf32>
    %cst_33 = arith.constant dense<0.000000e+00> : vector<16xf32>
    %126 = vector.multi_reduction <add>, %123, %cst_33 [1] : vector<16x32xf32> to vector<16xf32>
    %127 = vector.shape_cast %126 : vector<16xf32> to vector<16x1xf32>
    %cst_34 = arith.constant 3.200000e+01 : f32
    %128 = vector.broadcast %cst_34 : f32 to vector<16x1xf32>
    %129 = arith.divf %127, %128 : vector<16x1xf32>
    %130 = vector.broadcast %129 : vector<16x1xf32> to vector<16x32xf32>
    %131 = arith.subf %123, %130 : vector<16x32xf32>
    %132 = arith.mulf %131, %131 : vector<16x32xf32>
    %cst_35 = arith.constant dense<0.000000e+00> : vector<16xf32>
    %133 = vector.multi_reduction <add>, %132, %cst_35 [1] : vector<16x32xf32> to vector<16xf32>
    %134 = vector.shape_cast %133 : vector<16xf32> to vector<16x1xf32>
    %cst_36 = arith.constant 3.200000e+01 : f32
    %135 = vector.broadcast %cst_36 : f32 to vector<16x1xf32>
    %136 = arith.divf %134, %135 : vector<16x1xf32>
    %cst_37 = arith.constant 9.99999974E-6 : f32
    %137 = vector.broadcast %cst_37 : f32 to vector<16x1xf32>
    %138 = arith.addf %136, %137 : vector<16x1xf32>
    %139 = math.rsqrt %138 : vector<16x1xf32>
    %140 = vector.broadcast %139 : vector<16x1xf32> to vector<16x32xf32>
    %141 = arith.mulf %131, %140 : vector<16x32xf32>
    %142 = vector.broadcast %124 : vector<1x32xf32> to vector<16x32xf32>
    %143 = arith.mulf %141, %142 : vector<16x32xf32>
    %144 = vector.broadcast %125 : vector<1x32xf32> to vector<16x32xf32>
    %145 = arith.addf %143, %144 : vector<16x32xf32>
    %c216 = arith.constant 216 : index
    %c0_38 = arith.constant 0 : index
    %146 = vector.load %arg1[%c216, %c0_38] : memref<448x128xf32, #tpu.memory_space<vmem>>, vector<32x96xf32>
    %cst_39 = arith.constant dense<0.000000e+00> : vector<16x96xf32>
    %147 = tpu.matmul %145, %146, %cst_39 {dimension_numbers = #tpu.dot_dimension_numbers<[1], [0], [0], [1], [0, 0, 1, 1], [], []>} : vector<16x32xf32>, vector<32x96xf32>, vector<16x96xf32> -> vector<16x96xf32>
    %c248 = arith.constant 248 : index
    %c0_40 = arith.constant 0 : index
    %148 = vector.load %arg1[%c248, %c0_40] : memref<448x128xf32, #tpu.memory_space<vmem>>, vector<1x96xf32>
    %149 = vector.broadcast %148 : vector<1x96xf32> to vector<16x96xf32>
    %150 = arith.addf %147, %149 : vector<16x96xf32>
    %151 = vector.extract_strided_slice %150 {offsets = [0, 0], sizes = [8, 96], strides = [1, 1]} : vector<16x96xf32> to vector<8x96xf32>
    %152 = vector.extract_strided_slice %151 {offsets = [0, 0], sizes = [8, 8], strides = [1, 1]} : vector<8x96xf32> to vector<8x8xf32>
    %153 = vector.extract_strided_slice %151 {offsets = [0, 32], sizes = [8, 8], strides = [1, 1]} : vector<8x96xf32> to vector<8x8xf32>
    %154 = vector.extract_strided_slice %151 {offsets = [0, 64], sizes = [8, 8], strides = [1, 1]} : vector<8x96xf32> to vector<8x8xf32>
    %155 = vector.extract_strided_slice %151 {offsets = [0, 8], sizes = [8, 8], strides = [1, 1]} : vector<8x96xf32> to vector<8x8xf32>
    %156 = vector.extract_strided_slice %151 {offsets = [0, 40], sizes = [8, 8], strides = [1, 1]} : vector<8x96xf32> to vector<8x8xf32>
    %157 = vector.extract_strided_slice %151 {offsets = [0, 72], sizes = [8, 8], strides = [1, 1]} : vector<8x96xf32> to vector<8x8xf32>
    %158 = vector.extract_strided_slice %151 {offsets = [0, 16], sizes = [8, 8], strides = [1, 1]} : vector<8x96xf32> to vector<8x8xf32>
    %159 = vector.extract_strided_slice %151 {offsets = [0, 48], sizes = [8, 8], strides = [1, 1]} : vector<8x96xf32> to vector<8x8xf32>
    %160 = vector.extract_strided_slice %151 {offsets = [0, 80], sizes = [8, 8], strides = [1, 1]} : vector<8x96xf32> to vector<8x8xf32>
    %161 = vector.extract_strided_slice %151 {offsets = [0, 24], sizes = [8, 8], strides = [1, 1]} : vector<8x96xf32> to vector<8x8xf32>
    %162 = vector.extract_strided_slice %151 {offsets = [0, 56], sizes = [8, 8], strides = [1, 1]} : vector<8x96xf32> to vector<8x8xf32>
    %163 = vector.extract_strided_slice %151 {offsets = [0, 88], sizes = [8, 8], strides = [1, 1]} : vector<8x96xf32> to vector<8x8xf32>
    %164 = vector.extract_strided_slice %150 {offsets = [8, 0], sizes = [8, 96], strides = [1, 1]} : vector<16x96xf32> to vector<8x96xf32>
    %165 = vector.extract_strided_slice %164 {offsets = [0, 0], sizes = [8, 8], strides = [1, 1]} : vector<8x96xf32> to vector<8x8xf32>
    %166 = vector.extract_strided_slice %164 {offsets = [0, 32], sizes = [8, 8], strides = [1, 1]} : vector<8x96xf32> to vector<8x8xf32>
    %167 = vector.extract_strided_slice %164 {offsets = [0, 64], sizes = [8, 8], strides = [1, 1]} : vector<8x96xf32> to vector<8x8xf32>
    %168 = vector.extract_strided_slice %164 {offsets = [0, 8], sizes = [8, 8], strides = [1, 1]} : vector<8x96xf32> to vector<8x8xf32>
    %169 = vector.extract_strided_slice %164 {offsets = [0, 40], sizes = [8, 8], strides = [1, 1]} : vector<8x96xf32> to vector<8x8xf32>
    %170 = vector.extract_strided_slice %164 {offsets = [0, 72], sizes = [8, 8], strides = [1, 1]} : vector<8x96xf32> to vector<8x8xf32>
    %171 = vector.extract_strided_slice %164 {offsets = [0, 16], sizes = [8, 8], strides = [1, 1]} : vector<8x96xf32> to vector<8x8xf32>
    %172 = vector.extract_strided_slice %164 {offsets = [0, 48], sizes = [8, 8], strides = [1, 1]} : vector<8x96xf32> to vector<8x8xf32>
    %173 = vector.extract_strided_slice %164 {offsets = [0, 80], sizes = [8, 8], strides = [1, 1]} : vector<8x96xf32> to vector<8x8xf32>
    %174 = vector.extract_strided_slice %164 {offsets = [0, 24], sizes = [8, 8], strides = [1, 1]} : vector<8x96xf32> to vector<8x8xf32>
    %175 = vector.extract_strided_slice %164 {offsets = [0, 56], sizes = [8, 8], strides = [1, 1]} : vector<8x96xf32> to vector<8x8xf32>
    %176 = vector.extract_strided_slice %164 {offsets = [0, 88], sizes = [8, 8], strides = [1, 1]} : vector<8x96xf32> to vector<8x8xf32>
    %177 = vector.shape_cast %152 : vector<8x8xf32> to vector<1x8x8xf32>
    %178 = vector.shape_cast %155 : vector<8x8xf32> to vector<1x8x8xf32>
    %179 = vector.shape_cast %158 : vector<8x8xf32> to vector<1x8x8xf32>
    %180 = vector.shape_cast %161 : vector<8x8xf32> to vector<1x8x8xf32>
    %181 = vector.shape_cast %165 : vector<8x8xf32> to vector<1x8x8xf32>
    %182 = vector.shape_cast %168 : vector<8x8xf32> to vector<1x8x8xf32>
    %183 = vector.shape_cast %171 : vector<8x8xf32> to vector<1x8x8xf32>
    %184 = vector.shape_cast %174 : vector<8x8xf32> to vector<1x8x8xf32>
    %185 = tpu.concatenate %177, %178, %179, %180, %181, %182, %183, %184 in 0 : vector<1x8x8xf32>, vector<1x8x8xf32>, vector<1x8x8xf32>, vector<1x8x8xf32>, vector<1x8x8xf32>, vector<1x8x8xf32>, vector<1x8x8xf32>, vector<1x8x8xf32> -> vector<8x8x8xf32>
    %186 = vector.shape_cast %153 : vector<8x8xf32> to vector<1x8x8xf32>
    %187 = vector.shape_cast %156 : vector<8x8xf32> to vector<1x8x8xf32>
    %188 = vector.shape_cast %159 : vector<8x8xf32> to vector<1x8x8xf32>
    %189 = vector.shape_cast %162 : vector<8x8xf32> to vector<1x8x8xf32>
    %190 = vector.shape_cast %166 : vector<8x8xf32> to vector<1x8x8xf32>
    %191 = vector.shape_cast %169 : vector<8x8xf32> to vector<1x8x8xf32>
    %192 = vector.shape_cast %172 : vector<8x8xf32> to vector<1x8x8xf32>
    %193 = vector.shape_cast %175 : vector<8x8xf32> to vector<1x8x8xf32>
    %194 = tpu.concatenate %186, %187, %188, %189, %190, %191, %192, %193 in 0 : vector<1x8x8xf32>, vector<1x8x8xf32>, vector<1x8x8xf32>, vector<1x8x8xf32>, vector<1x8x8xf32>, vector<1x8x8xf32>, vector<1x8x8xf32>, vector<1x8x8xf32> -> vector<8x8x8xf32>
    %195 = vector.shape_cast %154 : vector<8x8xf32> to vector<1x8x8xf32>
    %196 = vector.shape_cast %157 : vector<8x8xf32> to vector<1x8x8xf32>
    %197 = vector.shape_cast %160 : vector<8x8xf32> to vector<1x8x8xf32>
    %198 = vector.shape_cast %163 : vector<8x8xf32> to vector<1x8x8xf32>
    %199 = vector.shape_cast %167 : vector<8x8xf32> to vector<1x8x8xf32>
    %200 = vector.shape_cast %170 : vector<8x8xf32> to vector<1x8x8xf32>
    %201 = vector.shape_cast %173 : vector<8x8xf32> to vector<1x8x8xf32>
    %202 = vector.shape_cast %176 : vector<8x8xf32> to vector<1x8x8xf32>
    %203 = tpu.concatenate %195, %196, %197, %198, %199, %200, %201, %202 in 0 : vector<1x8x8xf32>, vector<1x8x8xf32>, vector<1x8x8xf32>, vector<1x8x8xf32>, vector<1x8x8xf32>, vector<1x8x8xf32>, vector<1x8x8xf32>, vector<1x8x8xf32> -> vector<8x8x8xf32>
    "tpu.trace_start"() <{level = 10 : i32, message = "gqd,gkd->gqk"}> : () -> ()
    %cst_41 = arith.constant dense<0.000000e+00> : vector<8x8x8xf32>
    %204 = tpu.matmul %185, %194, %cst_41 {dimension_numbers = #tpu.dot_dimension_numbers<[2], [2], [1], [1], [0, 0, 0, 1, 1, 1], [0], [0]>} : vector<8x8x8xf32>, vector<8x8x8xf32>, vector<8x8x8xf32> -> vector<8x8x8xf32>
    "tpu.trace_stop"() : () -> ()
    %cst_42 = arith.constant dense<0xFF800000> : vector<8x8xf32>
    %205 = vector.multi_reduction <maximumf>, %204, %cst_42 [2] : vector<8x8x8xf32> to vector<8x8xf32>
    %206 = vector.shape_cast %205 : vector<8x8xf32> to vector<8x8x1xf32>
    %207 = vector.broadcast %206 : vector<8x8x1xf32> to vector<8x8x8xf32>
    %208 = arith.subf %204, %207 : vector<8x8x8xf32>
    %209 = math.exp %208 : vector<8x8x8xf32>
    %cst_43 = arith.constant dense<0.000000e+00> : vector<8x8xf32>
    %210 = vector.multi_reduction <add>, %209, %cst_43 [2] : vector<8x8x8xf32> to vector<8x8xf32>
    %211 = vector.shape_cast %210 : vector<8x8xf32> to vector<8x8x1xf32>
    %212 = tpu.reciprocal %211 {approx = true} : vector<8x8x1xf32> -> vector<8x8x1xf32>
    %213 = vector.broadcast %212 : vector<8x8x1xf32> to vector<8x8x8xf32>
    %214 = arith.mulf %209, %213 : vector<8x8x8xf32>
    "tpu.trace_start"() <{level = 10 : i32, message = "gqk,gkd->gqd"}> : () -> ()
    %cst_44 = arith.constant dense<0.000000e+00> : vector<8x8x8xf32>
    %215 = tpu.matmul %214, %203, %cst_44 {dimension_numbers = #tpu.dot_dimension_numbers<[2], [1], [1], [2], [0, 0, 0, 1, 1, 2], [0], [0]>} : vector<8x8x8xf32>, vector<8x8x8xf32>, vector<8x8x8xf32> -> vector<8x8x8xf32>
    "tpu.trace_stop"() : () -> ()
    %c256 = arith.constant 256 : index
    %c0_45 = arith.constant 0 : index
    %216 = vector.load %arg1[%c256, %c0_45] : memref<448x128xf32, #tpu.memory_space<vmem>>, vector<32x32xf32>
    %217 = vector.shape_cast %216 : vector<32x32xf32> to vector<4x8x32xf32>
    %218 = vector.extract_strided_slice %215 {offsets = [0, 0, 0], sizes = [4, 8, 8], strides = [1, 1, 1]} : vector<8x8x8xf32> to vector<4x8x8xf32>
    "tpu.trace_start"() <{level = 10 : i32, message = "nqd,ndh->nqh"}> : () -> ()
    %cst_46 = arith.constant dense<0.000000e+00> : vector<4x8x32xf32>
    %219 = tpu.matmul %218, %217, %cst_46 {dimension_numbers = #tpu.dot_dimension_numbers<[2], [1], [1], [2], [0, 0, 0, 1, 1, 2], [0], [0]>} : vector<4x8x8xf32>, vector<4x8x32xf32>, vector<4x8x32xf32> -> vector<4x8x32xf32>
    "tpu.trace_stop"() : () -> ()
    %cst_47 = arith.constant dense<0.000000e+00> : vector<8x32xf32>
    %220 = vector.multi_reduction <add>, %219, %cst_47 [0] : vector<4x8x32xf32> to vector<8x32xf32>
    %221 = vector.extract_strided_slice %215 {offsets = [4, 0, 0], sizes = [4, 8, 8], strides = [1, 1, 1]} : vector<8x8x8xf32> to vector<4x8x8xf32>
    "tpu.trace_start"() <{level = 10 : i32, message = "nqd,ndh->nqh"}> : () -> ()
    %cst_48 = arith.constant dense<0.000000e+00> : vector<4x8x32xf32>
    %222 = tpu.matmul %221, %217, %cst_48 {dimension_numbers = #tpu.dot_dimension_numbers<[2], [1], [1], [2], [0, 0, 0, 1, 1, 2], [0], [0]>} : vector<4x8x8xf32>, vector<4x8x32xf32>, vector<4x8x32xf32> -> vector<4x8x32xf32>
    "tpu.trace_stop"() : () -> ()
    %cst_49 = arith.constant dense<0.000000e+00> : vector<8x32xf32>
    %223 = vector.multi_reduction <add>, %222, %cst_49 [0] : vector<4x8x32xf32> to vector<8x32xf32>
    %224 = tpu.concatenate %220, %223 in 0 : vector<8x32xf32>, vector<8x32xf32> -> vector<16x32xf32>
    %c288 = arith.constant 288 : index
    %c0_50 = arith.constant 0 : index
    %225 = vector.load %arg1[%c288, %c0_50] : memref<448x128xf32, #tpu.memory_space<vmem>>, vector<1x32xf32>
    %226 = vector.broadcast %225 : vector<1x32xf32> to vector<16x32xf32>
    %227 = arith.addf %224, %226 : vector<16x32xf32>
    %228 = arith.addf %145, %227 : vector<16x32xf32>
    %c376 = arith.constant 376 : index
    %c0_51 = arith.constant 0 : index
    %229 = vector.load %arg1[%c376, %c0_51] : memref<448x128xf32, #tpu.memory_space<vmem>>, vector<1x32xf32>
    %c384 = arith.constant 384 : index
    %c0_52 = arith.constant 0 : index
    %230 = vector.load %arg1[%c384, %c0_52] : memref<448x128xf32, #tpu.memory_space<vmem>>, vector<1x32xf32>
    %cst_53 = arith.constant dense<0.000000e+00> : vector<16xf32>
    %231 = vector.multi_reduction <add>, %228, %cst_53 [1] : vector<16x32xf32> to vector<16xf32>
    %232 = vector.shape_cast %231 : vector<16xf32> to vector<16x1xf32>
    %cst_54 = arith.constant 3.200000e+01 : f32
    %233 = vector.broadcast %cst_54 : f32 to vector<16x1xf32>
    %234 = arith.divf %232, %233 : vector<16x1xf32>
    %235 = vector.broadcast %234 : vector<16x1xf32> to vector<16x32xf32>
    %236 = arith.subf %228, %235 : vector<16x32xf32>
    %237 = arith.mulf %236, %236 : vector<16x32xf32>
    %cst_55 = arith.constant dense<0.000000e+00> : vector<16xf32>
    %238 = vector.multi_reduction <add>, %237, %cst_55 [1] : vector<16x32xf32> to vector<16xf32>
    %239 = vector.shape_cast %238 : vector<16xf32> to vector<16x1xf32>
    %cst_56 = arith.constant 3.200000e+01 : f32
    %240 = vector.broadcast %cst_56 : f32 to vector<16x1xf32>
    %241 = arith.divf %239, %240 : vector<16x1xf32>
    %cst_57 = arith.constant 9.99999974E-6 : f32
    %242 = vector.broadcast %cst_57 : f32 to vector<16x1xf32>
    %243 = arith.addf %241, %242 : vector<16x1xf32>
    %244 = math.rsqrt %243 : vector<16x1xf32>
    %245 = vector.broadcast %244 : vector<16x1xf32> to vector<16x32xf32>
    %246 = arith.mulf %236, %245 : vector<16x32xf32>
    %247 = vector.broadcast %229 : vector<1x32xf32> to vector<16x32xf32>
    %248 = arith.mulf %246, %247 : vector<16x32xf32>
    %249 = vector.broadcast %230 : vector<1x32xf32> to vector<16x32xf32>
    %250 = arith.addf %248, %249 : vector<16x32xf32>
    %c296 = arith.constant 296 : index
    %c0_58 = arith.constant 0 : index
    %251 = vector.load %arg1[%c296, %c0_58] : memref<448x128xf32, #tpu.memory_space<vmem>>, vector<32x32xf32>
    %cst_59 = arith.constant dense<0.000000e+00> : vector<16x32xf32>
    %252 = tpu.matmul %250, %251, %cst_59 {dimension_numbers = #tpu.dot_dimension_numbers<[1], [0], [0], [1], [0, 0, 1, 1], [], []>} : vector<16x32xf32>, vector<32x32xf32>, vector<16x32xf32> -> vector<16x32xf32>
    %c328 = arith.constant 328 : index
    %c0_60 = arith.constant 0 : index
    %253 = vector.load %arg1[%c328, %c0_60] : memref<448x128xf32, #tpu.memory_space<vmem>>, vector<1x32xf32>
    %254 = vector.broadcast %253 : vector<1x32xf32> to vector<16x32xf32>
    %255 = arith.addf %252, %254 : vector<16x32xf32>
    %cst_61 = arith.constant 0.000000e+00 : f32
    %256 = vector.broadcast %cst_61 : f32 to vector<16x32xf32>
    %257 = arith.maximumf %255, %256 : vector<16x32xf32>
    %c336 = arith.constant 336 : index
    %c0_62 = arith.constant 0 : index
    %258 = vector.load %arg1[%c336, %c0_62] : memref<448x128xf32, #tpu.memory_space<vmem>>, vector<32x32xf32>
    %cst_63 = arith.constant dense<0.000000e+00> : vector<16x32xf32>
    %259 = tpu.matmul %257, %258, %cst_63 {dimension_numbers = #tpu.dot_dimension_numbers<[1], [0], [0], [1], [0, 0, 1, 1], [], []>} : vector<16x32xf32>, vector<32x32xf32>, vector<16x32xf32> -> vector<16x32xf32>
    %c368 = arith.constant 368 : index
    %c0_64 = arith.constant 0 : index
    %260 = vector.load %arg1[%c368, %c0_64] : memref<448x128xf32, #tpu.memory_space<vmem>>, vector<1x32xf32>
    %261 = vector.broadcast %260 : vector<1x32xf32> to vector<16x32xf32>
    %262 = arith.addf %259, %261 : vector<16x32xf32>
    %263 = arith.addf %250, %262 : vector<16x32xf32>
    %c392 = arith.constant 392 : index
    %c0_65 = arith.constant 0 : index
    %264 = vector.load %arg1[%c392, %c0_65] : memref<448x128xf32, #tpu.memory_space<vmem>>, vector<1x32xf32>
    %c400 = arith.constant 400 : index
    %c0_66 = arith.constant 0 : index
    %265 = vector.load %arg1[%c400, %c0_66] : memref<448x128xf32, #tpu.memory_space<vmem>>, vector<1x32xf32>
    %cst_67 = arith.constant dense<0.000000e+00> : vector<16xf32>
    %266 = vector.multi_reduction <add>, %263, %cst_67 [1] : vector<16x32xf32> to vector<16xf32>
    %267 = vector.shape_cast %266 : vector<16xf32> to vector<16x1xf32>
    %cst_68 = arith.constant 3.200000e+01 : f32
    %268 = vector.broadcast %cst_68 : f32 to vector<16x1xf32>
    %269 = arith.divf %267, %268 : vector<16x1xf32>
    %270 = vector.broadcast %269 : vector<16x1xf32> to vector<16x32xf32>
    %271 = arith.subf %263, %270 : vector<16x32xf32>
    %272 = arith.mulf %271, %271 : vector<16x32xf32>
    %cst_69 = arith.constant dense<0.000000e+00> : vector<16xf32>
    %273 = vector.multi_reduction <add>, %272, %cst_69 [1] : vector<16x32xf32> to vector<16xf32>
    %274 = vector.shape_cast %273 : vector<16xf32> to vector<16x1xf32>
    %cst_70 = arith.constant 3.200000e+01 : f32
    %275 = vector.broadcast %cst_70 : f32 to vector<16x1xf32>
    %276 = arith.divf %274, %275 : vector<16x1xf32>
    %cst_71 = arith.constant 9.99999974E-6 : f32
    %277 = vector.broadcast %cst_71 : f32 to vector<16x1xf32>
    %278 = arith.addf %276, %277 : vector<16x1xf32>
    %279 = math.rsqrt %278 : vector<16x1xf32>
    %280 = vector.broadcast %279 : vector<16x1xf32> to vector<16x32xf32>
    %281 = arith.mulf %271, %280 : vector<16x32xf32>
    %282 = vector.broadcast %264 : vector<1x32xf32> to vector<16x32xf32>
    %283 = arith.mulf %281, %282 : vector<16x32xf32>
    %284 = vector.broadcast %265 : vector<1x32xf32> to vector<16x32xf32>
    %285 = arith.addf %283, %284 : vector<16x32xf32>
    %c408 = arith.constant 408 : index
    %c0_72 = arith.constant 0 : index
    %286 = vector.load %arg1[%c408, %c0_72] : memref<448x128xf32, #tpu.memory_space<vmem>>, vector<32x128xf32>
    %cst_73 = arith.constant dense<0.000000e+00> : vector<16x128xf32>
    %287 = tpu.matmul %285, %286, %cst_73 {dimension_numbers = #tpu.dot_dimension_numbers<[1], [0], [0], [1], [0, 0, 1, 1], [], []>} : vector<16x32xf32>, vector<32x128xf32>, vector<16x128xf32> -> vector<16x128xf32>
    %c440 = arith.constant 440 : index
    %c0_74 = arith.constant 0 : index
    %288 = vector.load %arg1[%c440, %c0_74] : memref<448x128xf32, #tpu.memory_space<vmem>>, vector<1x128xf32>
    %289 = vector.broadcast %288 : vector<1x128xf32> to vector<16x128xf32>
    %290 = arith.addf %287, %289 : vector<16x128xf32>
    %c0_75 = arith.constant 0 : index
    %c0_76 = arith.constant 0 : index
    %291 = vector.load %arg2[%c0_75, %c0_76] : memref<16x128xf32, #tpu.memory_space<vmem>>, vector<16x128xf32>
    tpu.vector_store %arg2[%c0_75, %c0_76], %290 {strides = array<i32>} : memref<16x128xf32, #tpu.memory_space<vmem>>, vector<16x128xf32>,
    return
  }
}

</mosaic_0001>

<bundles_post_ra>
// kernel: tpu_custom_call.1
= control target key start
LH: loop header
LB: loop body
LE: loop exit
PB: predicated region body
PF: predicated region fallthrough
CT: control target
= control target key end

     0   :  { %7 = vsyncpa [#allocation3], 0  ;;  %s2715_s0 = inlined_call_operand.hbm [shape: f32[16,16], index: 0, kind: input, shape index: {}]   ;;  %s2716_s1 = inlined_call_operand.hbm [shape: f32[448,128], index: 1, kind: input, shape index: {}]   ;;  %s2717_s2 = inlined_call_operand.hbm [shape: f32[16,128], index: 2, kind: output, shape index: {}]  }
   0x1   :  { %8 = vsyncpa [#allocation6], 0 }
   0x2   :  { %9 = vsyncpa [#allocation4], 0  ;;  %s14_s11 = sshll.u32 %s2715_s0, 4  ;;  %s2330_s12 = smov [#allocation2]   ;;  %s15_s11 = int_to_ptr.hbm [resolvable:$true] %s14_s11 }
   0x3   :  { %s16_s13 = sshll.u32 %s2330_s12, 4  ;;  %s27_s16 = sshll.u32 %s2716_s1, 4  ;;  %s17_s13 = int_to_ptr.vmem [resolvable:$true] %s16_s13  ;;  %s28_s16 = int_to_ptr.hbm [resolvable:$true] %s27_s16 }
   0x4   :  { %s2331_s17 = smov 128   ;;  %s2332_s18 = smov 8  }
   0x5   :  { %22 = dma.hbm_to_vmem [thread:$0]  %s15_s11, 256, %s17_s13, [#allocation3], %s2331_s17, %s2331_s17, %s2332_s18  }
   0x6   :  { %s2333_s19 = smov [#allocation5]  }
   0x7   :  { %s29_s20 = sshll.u32 %s2333_s19, 4  ;;  %s30_s20 = int_to_ptr.vmem [resolvable:$true] %s29_s20 }
   0x8   :  { %35 = dma.hbm_to_vmem [thread:$0]  %s28_s16, 7168, %s30_s20, [#allocation6], %s2331_s17, %s2331_s17, %s2332_s18  }
   0x9   :  { %2324 = dma.done.wait [#allocation3], 256  }
   0xa   :  { %2325 = vsyncadd [#allocation3], 4294967040 }
   0xb   :  { %2326 = dma.done.wait [#allocation6], 7168  }
   0xc   :  { %2327 = vsyncadd [#allocation6], 4294960128  ;;  %v47_v0 = vld [vmem:[#allocation5 + $0x8] sm:$0xff]  ;;  %v46_v1 = vld [vmem:[#allocation5] sm:$0xff]  ;;  %vm50_vm0 = vcmask 130048   ;;  %vm86_vm1 = vcmask 261120  }
   0xd   :  { %71 = vmatpush.msra.mxu0 %v47_v0  ;;  %2104 = vmatpush.msra.mxu2 %v47_v0  ;;  %v44_v2 = vld [vmem:[#allocation2] sm:$0xff]  ;;  %v45_v3 = vld [vmem:[#allocation2 + $0x8] sm:$0xff]  ;;  %v82_v5 = vld [vmem:[#allocation5 + $0x28] sm:$0xff]  ;;  %s2334_s0 = smov 104   ;;  %s2335_s1 = smov 120   ;;  %vm132_vm2 = vcmask 64512  }
   0xe   :  { %v83_v4 = vld [vmem:[#allocation5 + $0x30] sm:$0xff]  ;;  %v81_v6 = vld [vmem:[#allocation5 + $0x20] sm:$0xff]  ;;  %v80_v7 = vld [vmem:[#allocation5 + $0x18] sm:$0xff]  ;;  %s2336_s21 = smov 112   ;;  %s2337_s22 = smov 96  }
   0xf   :  { %105 = vmatpush.msra.mxu1 %v83_v4  ;;  %72 = vmatpush.msra.mxu0 %v46_v1  ;;  %v2152_v8 = vld [vmem:[#allocation5 + $0x10] ss:$0 sm:$0xff]  ;;  %v2153_v13 = vld [vmem:[#allocation5 + $0x38] ss:$0 sm:$0xff]  ;;  %s2338_s23 = smov 64   ;;  %s2340_s24 = smov [#allocation7]  }
  0x10   :  { %2105 = vmatpush.msra.mxu2 %v46_v1  ;;  %2024 = vmatmul.msk.f32.vlgmr.msra.gmra.mxu0 %vm50_vm0, %v44_v2  ;;  %s2008_s25 = sshll.u32 %s2340_s24, 4  ;;  %s2010_s28 = sshll.u32 %s2717_s2, 4  ;;  %s2009_s25 = int_to_ptr.vmem [resolvable:$true] %s2008_s25  ;;  %s2011_s28 = int_to_ptr.hbm [resolvable:$true] %s2010_s28 }
  0x11   :  { %2025 = vmatmul.msk.f32.vlgmr.msra.gmra.mxu2 %vm50_vm0, %v45_v3  ;;  %106 = vmatpush.msra.mxu1 %v82_v5 }
  0x13   :  { %107 = vmatpush.msra.mxu1 %v81_v6 }
  0x15   :  { %108 = vmatpush.msra.mxu1 %v80_v7 }
  0x8d   :  { %v74_v9 = vpop.f32.mrf.mxu0 }
  0x8e   :  { %v2368_v10 = vadd.f32 %v2152_v8, %v74_v9 }
  0x90   :  { %2026 = vmatmul.msk.f32.vlgmr.msra.gmra.mxu1 %vm86_vm1, %v2368_v10 }
  0x94   :  { %v77_v11 = vpop.f32.mrf.mxu2 }
  0x95   :  { %v2372_v12 = vadd.f32 %v2152_v8, %v77_v11 }
  0x98   :  { %2027 = vmatmul.msk.f32.gmra.mxu1 %vm86_vm1, %v2372_v12 }
 0x10d   :  { %v110_v14 = vpop.f32.mrf.mxu1 }
 0x10e   :  { %v2376_v15 = vadd.f32 %v2153_v13, %v110_v14 }
 0x110   :  { %121 = vrot.lane.b32.xlu1 %v2376_v15, %s2334_s0  ;;  %117 = vrot.lane.b32.xlu0 %v2376_v15, %s2335_s1 }
 0x115   :  { %v113_v16 = vpop.f32.mrf.mxu1 }
 0x116   :  { %v2382_v17 = vadd.f32 %v2153_v13, %v113_v16 }
 0x118   :  { %126 = vrot.lane.b32.xlu2 %v2382_v17, %s2336_s21  ;;  %124 = vrot.lane.b32.xlu1 %v2382_v17, %s2335_s1 }
 0x119   :  { %119 = vrot.lane.b32.xlu0 %v2376_v15, %s2336_s21 }
 0x120   :  { %128 = vrot.lane.b32.xlu2 %v2382_v17, %s2334_s0 }
 0x121   :  { %130 = vrot.lane.b32.xlu0 %v2376_v15, %s2337_s22 }
 0x172   :  { %v2402_v20 = vpop.permute.xlu2 %126 }
 0x17a   :  { %v2414_v23 = vpop.permute.xlu2 %128 }
 0x182   :  { %v2394_v18 = vpop.permute.xlu1 %121  ;;  %v2396_v19 = vpop.permute.xlu0 %117 }
 0x183   :  { %209 = vrot.lane.b32.xlu0 %v2394_v18, %s2337_s22  ;;  %157 = vrot.lane.b32.xlu1 %v2396_v19, %s2337_s22 }
 0x18a   :  { %v2404_v21 = vpop.permute.xlu1 %124 }
 0x18b   :  { %v2406_v22 = vpop.permute.xlu0 %119  ;;  %235 = vrot.lane.b32.xlu0 %v2382_v17, %s2337_s22  ;;  %261 = vrot.lane.b32.xlu1 %v2404_v21, %s2337_s22 }
 0x18c   :  { %183 = vrot.lane.b32.xlu2 %v2406_v22, %s2337_s22  ;;  %v2117_v51 = vpack.i.bf16 %v2406_v22, %v2396_v19 }
 0x193   :  { %v131_v24 = vpop.permute.xlu0 %130  ;;  %313 = vrot.lane.b32.xlu1 %v2414_v23, %s2337_s22 }
 0x194   :  { %287 = vrot.lane.b32.xlu2 %v2402_v20, %s2337_s22  ;;  %2028 = vmatpush.xpose.msk.msrb.mxu2 %vm132_vm2, %v131_v24 }
 0x197   :  { %2029 = vmatmul.msk.f32.vlgmr.msrb.gmra.mxu2 %vm132_vm2, %v2376_v15 }
 0x1e6   :  { %v184_v25 = vpop.permute.xlu2 %183 }
 0x1e7   :  { %2032 = vmatpush.xpose.msk.msra.mxu2 %vm132_vm2, %v184_v25 }
 0x1ea   :  { %2033 = vmatmul.msk.f32.vlgmr.msra.gmra.mxu2 %vm132_vm2, %v2406_v22 }
 0x1ee   :  { %v288_v28 = vpop.permute.xlu2 %287 }
 0x1f5   :  { %v158_v26 = vpop.permute.xlu1 %157  ;;  %v210_v27 = vpop.permute.xlu0 %209 }
 0x1f6   :  { %2030 = vmatpush.xpose.msk.msra.mxu3 %vm132_vm2, %v158_v26 }
 0x1f9   :  { %2031 = vmatmul.msk.f32.vlgmr.msra.gmra.mxu3 %vm132_vm2, %v2396_v19 }
 0x1fa   :  { %2034 = vmatpush.xpose.msk.msrb.mxu3 %vm132_vm2, %v210_v27  ;;  %v2127_v27 = vpack.i.bf16 %v2394_v18, %v2376_v15 }
 0x1fd   :  { %v262_v29 = vpop.permute.xlu1 %261  ;;  %v236_v30 = vpop.permute.xlu0 %235 }
 0x1fe   :  { %2040 = vmatpush.xpose.msk.msra.mxu3 %vm132_vm2, %v288_v28  ;;  %2036 = vmatpush.xpose.msk.msrb.mxu0 %vm132_vm2, %v236_v30 }
 0x1ff   :  { %2038 = vmatpush.xpose.msk.msrb.mxu2 %vm132_vm2, %v262_v29 }
 0x201   :  { %2035 = vmatmul.msk.f32.vlgmr.msrb.gmra.mxu3 %vm132_vm2, %v2394_v18  ;;  %2037 = vmatmul.msk.f32.vlgmr.msrb.gmra.mxu0 %vm132_vm2, %v2382_v17  ;;  %v2122_v18 = vpack.i.bf16 %v2402_v20, %v2404_v21 }
 0x202   :  { %2039 = vmatmul.msk.f32.vlgmr.msrb.gmra.mxu2 %vm132_vm2, %v2404_v21 }
 0x205   :  { %v314_v31 = vpop.permute.xlu1 %313 }
 0x206   :  { %2042 = vmatpush.xpose.msk.msrb.mxu1 %vm132_vm2, %v314_v31 }
 0x209   :  { %2041 = vmatmul.msk.f32.vlgmr.msra.gmra.mxu3 %vm132_vm2, %v2402_v20  ;;  %2043 = vmatmul.msk.f32.vlgmr.msrb.gmra.mxu1 %vm132_vm2, %v2414_v23 }
 0x21a   :  { %v154_v32 = vpop.f32.mrf.mxu2 }
 0x21b   :  { %v339_v33 = vsel %vm132_vm2, %v154_v32, -inf }
 0x21c   :  { %340 = vmax.xlane.f32.xlu2 %v339_v33 }
 0x26d   :  { %v206_v34 = vpop.f32.mrf.mxu2 }
 0x26e   :  { %v345_v35 = vsel %vm132_vm2, %v206_v34, -inf }
 0x26f   :  { %346 = vmax.xlane.f32.xlu0 %v345_v35 }
 0x27c   :  { %v180_v36 = vpop.f32.mrf.mxu3 }
 0x27d   :  { %v342_v37 = vsel %vm132_vm2, %v180_v36, -inf }
 0x27e   :  { %343 = vmax.xlane.f32.xlu2 %v342_v37  ;;  %v258_v38 = vpop.f32.mrf.mxu0 }
 0x27f   :  { %v351_v39 = vsel %vm132_vm2, %v258_v38, -inf }
 0x280   :  { %352 = vmax.xlane.f32.xlu1 %v351_v39 }
 0x284   :  { %v2448_v40 = vpop.f32.mrf.mxu3 }
 0x285   :  { %v284_v41 = vpop.f32.mrf.mxu2  ;;  %v348_v42 = vsel %vm132_vm2, %v2448_v40, -inf }
 0x286   :  { %349 = vmax.xlane.f32.xlu0 %v348_v42  ;;  %v354_v43 = vsel %vm132_vm2, %v284_v41, -inf  ;;  %v336_v48 = vpop.f32.mrf.mxu1 }
 0x287   :  { %v360_v50 = vsel %vm132_vm2, %v336_v48, -inf }
 0x288   :  { %355 = vmax.xlane.f32.xlu1 %v354_v43 }
 0x28c   :  { %v2453_v44 = vpop.f32.mrf.mxu3 }
 0x28d   :  { %v357_v45 = vsel %vm132_vm2, %v2453_v44, -inf }
 0x28e   :  { %358 = vmax.xlane.f32.xlu2 %v357_v45 }
 0x28f   :  { %v341_v46 = vpop.xlane.xlu2 %340 }
 0x290   :  { %v363_v47 = vsub.f32 %v154_v32, %v341_v46 }
 0x292   :  { %v371_v49 = vmul.f32 1.442695, %v363_v47 }
 0x294   :  { %2170 = vpow2.f32 %v371_v49 }
 0x296   :  { %361 = vmax.xlane.f32.xlu2 %v360_v50 }
 0x29a   :  { %v2460_v52 = vpop.eup %2170  ;;  %2118 = vrot.lane.b32.xlu0 %v2117_v51, %s2338_s23 }
 0x29b   :  { %v387_v53 = vsel %vm132_vm2, %v2460_v52, 0.0 }
 0x29e   :  { %388 = vadd.xlane.f32.xlu2 %v387_v53 }
 0x2e2   :  { %v347_v54 = vpop.xlane.xlu0 %346 }
 0x2e3   :  { %v365_v55 = vsub.f32 %v206_v34, %v347_v54 }
 0x2e5   :  { %v375_v56 = vmul.f32 1.442695, %v365_v55 }
 0x2e7   :  { %2172 = vpow2.f32 %v375_v56 }
 0x2ed   :  { %v2173_v57 = vpop.eup %2172 }
 0x2ee   :  { %v393_v58 = vsel %vm132_vm2, %v2173_v57, 0.0 }
 0x2ef   :  { %394 = vadd.xlane.f32.xlu1 %v393_v58 }
 0x2f1   :  { %v344_v59 = vpop.xlane.xlu2 %343 }
 0x2f2   :  { %v364_v60 = vsub.f32 %v180_v36, %v344_v59 }
 0x2f3   :  { %v353_v61 = vpop.xlane.xlu1 %352 }
 0x2f4   :  { %v373_v62 = vmul.f32 1.442695, %v364_v60  ;;  %v367_v63 = vsub.f32 %v258_v38, %v353_v61 }
 0x2f6   :  { %2174 = vpow2.f32 %v373_v62  ;;  %v379_v0 = vmul.f32 1.442695, %v367_v63 }
 0x2f8   :  { %2176 = vpow2.f32 %v379_v0  ;;  %v637_v0 = vld [vmem:[#allocation5 + $0x50] sm:$0xff] }
 0x2f9   :  { %v350_v9 = vpop.xlane.xlu0 %349 }
 0x2fa   :  { %v366_v19 = vsub.f32 %v2448_v40, %v350_v9 }
 0x2fb   :  { %v356_v1 = vpop.xlane.xlu1 %355 }
 0x2fc   :  { %v2175_v2 = vpop.eup %2174  ;;  %v368_v3 = vsub.f32 %v284_v41, %v356_v1  ;;  %v377_v28 = vmul.f32 1.442695, %v366_v19  ;;  %v636_v1 = vld [vmem:[#allocation5 + $0x48] sm:$0xff] }
 0x2fd   :  { %v390_v4 = vsel %vm132_vm2, %v2175_v2, 0.0 }
 0x2fe   :  { %v2467_v5 = vpop.eup %2176  ;;  %v381_v6 = vmul.f32 1.442695, %v368_v3  ;;  %391 = vadd.xlane.f32.xlu0 %v390_v4  ;;  %v638_v4 = vld [vmem:[#allocation5 + $0x58] sm:$0xff] }
 0x2ff   :  { %v399_v7 = vsel %vm132_vm2, %v2467_v5, 0.0 }
 0x300   :  { %2178 = vpow2.f32 %v381_v6  ;;  %400 = vadd.xlane.f32.xlu1 %v399_v7 }
 0x301   :  { %v359_v8 = vpop.xlane.xlu2 %358 }
 0x302   :  { %v369_v30 = vsub.f32 %v2453_v44, %v359_v8 }
 0x304   :  { %v383_v32 = vmul.f32 1.442695, %v369_v30 }
 0x306   :  { %v2179_v11 = vpop.eup %2178 }
 0x307   :  { %v402_v13 = vsel %vm132_vm2, %v2179_v11, 0.0 }
 0x308   :  { %403 = vadd.xlane.f32.xlu2 %v402_v13 }
 0x309   :  { %v362_v14 = vpop.xlane.xlu2 %361 }
 0x30a   :  { %v370_v16 = vsub.f32 %v336_v48, %v362_v14 }
 0x30c   :  { %v385_v22 = vmul.f32 1.442695, %v370_v16  ;;  %v2119_v24 = vpop.permute.xlu0 %2118 }
 0x30d   :  { %v2121_v25 = vunpack.i.h.bf16 %v2119_v24  ;;  %v2120_v26 = vunpack.i.l.bf16 %v2119_v24 }
 0x30e   :  { %2180 = vpow2.f32 %v385_v22 }
 0x30f   :  { %474 = vmatpush.msra.mxu2 %v2120_v26  ;;  %500 = vmatpush.msrb.mxu3 %v2121_v25  ;;  %2182 = vpow2.f32 %v377_v28 }
 0x310   :  { %2184 = vpow2.f32 %v383_v32 }
 0x311   :  { %v389_v39 = vpop.xlane.xlu2 %388 }
 0x312   :  { %2128 = vrot.lane.b32.xlu0 %v2127_v27, %s2338_s23 }
 0x314   :  { %v2476_v29 = vpop.eup %2180 }
 0x315   :  { %v408_v31 = vsel %vm132_vm2, %v2476_v29, 0.0  ;;  %v2183_v33 = vpop.eup %2182 }
 0x316   :  { %409 = vadd.xlane.f32.xlu1 %v408_v31  ;;  %v396_v15 = vsel %vm132_vm2, %v2183_v33, 0.0  ;;  %v2185_v34 = vpop.eup %2184 }
 0x317   :  { %v405_v35 = vsel %vm132_vm2, %v2185_v34, 0.0 }
 0x31a   :  { %531 = vrot.lane.b32.xlu0 %v2382_v17, %s2338_s23 }
 0x31e   :  { %397 = vadd.xlane.f32.xlu1 %v396_v15 }
 0x320   :  { %2123 = vrot.lane.b32.xlu2 %v2122_v18, %s2338_s23 }
 0x326   :  { %406 = vadd.xlane.f32.xlu1 %v405_v35 }
 0x33f   :  { %609 = vrot.lane.b32.xlu1 %v2414_v23, %s2338_s23 }
 0x362   :  { %v395_v36 = vpop.xlane.xlu1 %394 }
 0x363   :  { %2186 = vrcp.f32 %v395_v36 }
 0x369   :  { %v2187_v37 = vpop.eup %2186 }
 0x36a   :  { %v421_v17 = vmul.f32 %v2187_v37, %v2173_v57 }
 0x36c   :  { %2046 = vmatmul.msk.f32.vlgmr.msrb.gmra.mxu3 %vm132_vm2, %v421_v17 }
 0x371   :  { %v392_v38 = vpop.xlane.xlu0 %391 }
 0x372   :  { %2188 = vrcp.f32 %v392_v38 }
 0x373   :  { %2190 = vrcp.f32 %v389_v39  ;;  %v401_v41 = vpop.xlane.xlu1 %400 }
 0x378   :  { %v2189_v20 = vpop.eup %2188 }
 0x379   :  { %v420_v21 = vmul.f32 %v2189_v20, %v2175_v2  ;;  %v2191_v42 = vpop.eup %2190  ;;  %v635_v2 = vld [vmem:[#allocation5 + $0x40] sm:$0xff] }
 0x37a   :  { %v419_v49 = vmul.f32 %v2191_v42, %v2460_v52 }
 0x37b   :  { %v404_v40 = vpop.xlane.xlu2 %403  ;;  %2045 = vmatmul.msk.f32.vlgmr.msra.gmra.mxu2 %vm132_vm2, %v420_v21 }
 0x37c   :  { %2192 = vrcp.f32 %v404_v40 }
 0x37d   :  { %2194 = vrcp.f32 %v401_v41 }
 0x382   :  { %v2193_v43 = vpop.eup %2192 }
 0x383   :  { %v2124_v23 = vpop.permute.xlu2 %2123  ;;  %v424_v50 = vmul.f32 %v2193_v43, %v2179_v11  ;;  %v2195_v53 = vpop.eup %2194  ;;  %v2339_v43 = vmov 32.0  }
 0x384   :  { %v2126_v44 = vunpack.i.h.bf16 %v2124_v23  ;;  %v2125_v45 = vunpack.i.l.bf16 %v2124_v23  ;;  %v2129_v46 = vpop.permute.xlu0 %2128  ;;  %v423_v55 = vmul.f32 %v2195_v53, %v2467_v5 }
 0x385   :  { %v2131_v47 = vunpack.i.h.bf16 %v2129_v46  ;;  %v2130_v48 = vunpack.i.l.bf16 %v2129_v46 }
 0x386   :  { %578 = vmatpush.msrb.mxu2 %v2125_v45  ;;  %604 = vmatpush.msra.mxu3 %v2126_v44 }
 0x387   :  { %448 = vmatpush.msra.mxu0 %v2130_v48  ;;  %526 = vmatpush.msra.mxu1 %v2131_v47 }
 0x388   :  { %2049 = vmatmul.msk.f32.vlgmr.msrb.gmra.mxu2 %vm132_vm2, %v424_v50  ;;  %2044 = vmatmul.msk.f32.vlgmr.msra.gmra.mxu0 %vm132_vm2, %v419_v49 }
 0x389   :  { %v410_v51 = vpop.xlane.xlu1 %409  ;;  %703 = vmatpush.msrb.mxu3 %v637_v0  ;;  %680 = vmatpush.msra.mxu2 %v636_v1 }
 0x38b   :  { %779 = vmatpush.msrb.mxu2 %v636_v1 }
 0x38c   :  { %v532_v54 = vpop.permute.xlu0 %531 }
 0x38d   :  { %552 = vmatpush.msrb.mxu0 %v532_v54 }
 0x38f   :  { %657 = vmatpush.msra.mxu0 %v635_v2 }
 0x390   :  { %2048 = vmatmul.msk.f32.vlgmr.msrb.gmra.mxu0 %vm132_vm2, %v423_v55 }
 0x391   :  { %v398_v56 = vpop.xlane.xlu1 %397  ;;  %756 = vmatpush.msrb.mxu0 %v635_v2 }
 0x392   :  { %2196 = vrcp.f32 %v398_v56 }
 0x398   :  { %v2197_v52 = vpop.eup %2196 }
 0x399   :  { %v422_v57 = vmul.f32 %v2197_v52, %v2183_v33  ;;  %v407_v58 = vpop.xlane.xlu1 %406 }
 0x39a   :  { %2198 = vrcp.f32 %v407_v58  ;;  %v905_v58 = vld [vmem:[#allocation5 + $0x80] sm:$0xff] }
 0x39b   :  { %2047 = vmatmul.msk.f32.vlgmr.msra.gmra.mxu1 %vm132_vm2, %v422_v57  ;;  %2200 = vrcp.f32 %v410_v51 }
 0x39c   :  { %2202 = vrcp.f32 %v2339_v43 }
 0x3a0   :  { %v2199_v59 = vpop.eup %2198 }
 0x3a1   :  { %v425_v60 = vmul.f32 %v2199_v59, %v2185_v34  ;;  %v2201_v61 = vpop.eup %2200  ;;  %v904_v59 = vld [vmem:[#allocation5 + $0x78] sm:$0xff] }
 0x3a2   :  { %v426_v62 = vmul.f32 %v2201_v61, %v2476_v29  ;;  %v2154_v29 = vld [vmem:[#allocation5 + $0x60] ss:$0 sm:$0xff]  ;;  %v2203_v23 = vpop.eup %2202  ;;  %v902_v61 = vld [vmem:[#allocation5 + $0x68] sm:$0xff] }
 0x3a3   :  { %2050 = vmatmul.msk.f32.vlgmr.msra.gmra.mxu3 %vm132_vm2, %v425_v60  ;;  %v852_v44 = vmul.f32 32.0, %v2203_v23  ;;  %vm856_vm3 = vweird.f32 %v2203_v23  ;;  %v903_v60 = vld [vmem:[#allocation5 + $0x70] sm:$0xff] }
 0x3a4   :  { %802 = vmatpush.msra.mxu3 %v637_v0 }
 0x3a5   :  { %v853_v45 = vsub.f32 1.0, %v852_v44 }
 0x3a7   :  { %v854_v46 = vmul.f32 %v2203_v23, %v853_v45 }
 0x3a9   :  { %v855_v47 = vadd.f32 %v2203_v23, %v854_v46 }
 0x3ab   :  { %v2521_v48 = vsel %vm856_vm3, %v2203_v23, %v855_v47 }
 0x3b1   :  { %v610_v63 = vpop.permute.xlu1 %609 }
 0x3b2   :  { %630 = vmatpush.msrb.mxu1 %v610_v63 }
 0x3b3   :  { %2051 = vmatmul.msk.f32.vlgmr.msrb.gmra.mxu1 %vm132_vm2, %v426_v62 }
 0x3b4   :  { %726 = vmatpush.msra.mxu1 %v638_v4 }
 0x3b6   :  { %825 = vmatpush.msrb.mxu1 %v638_v4 }
 0x3ef   :  { %v502_v3 = vpop.f32.mrf.mxu3 }
 0x3f0   :  { %2054 = vmatmul.msk.f32.vlgmr.msrb.gmra.mxu3 %vm132_vm2, %v502_v3 }
 0x3fe   :  { %v476_v5 = vpop.f32.mrf.mxu2 }
 0x3ff   :  { %2053 = vmatmul.msk.f32.vlgmr.msra.gmra.mxu2 %vm132_vm2, %v476_v5 }
 0x405   :  { %v450_v6 = vpop.f32.mrf.mxu0 }
 0x406   :  { %2052 = vmatmul.msk.f32.vlgmr.msra.gmra.mxu0 %vm132_vm2, %v450_v6 }
 0x407   :  { %926 = vmatpush.msra.mxu0 %v905_v58  ;;  %v1030_v58 = vld [vmem:[#allocation5 + $0xe8] sm:$0xff] }
 0x409   :  { %927 = vmatpush.msra.mxu0 %v904_v59  ;;  %v1029_v59 = vld [vmem:[#allocation5 + $0xe0] sm:$0xff] }
 0x40b   :  { %v580_v7 = vpop.f32.mrf.mxu2  ;;  %928 = vmatpush.msra.mxu0 %v903_v60  ;;  %v1028_v60 = vld [vmem:[#allocation5 + $0xd8] sm:$0xff] }
 0x40c   :  { %2057 = vmatmul.msk.f32.vlgmr.msrb.gmra.mxu2 %vm132_vm2, %v580_v7  ;;  %v2155_v7 = vld [vmem:[#allocation5 + $0xb8] ss:$0 sm:$0xff] }
 0x40d   :  { %v554_v8 = vpop.f32.mrf.mxu0  ;;  %929 = vmatpush.msra.mxu0 %v902_v61 }
 0x40e   :  { %2056 = vmatmul.msk.f32.vlgmr.msrb.gmra.mxu0 %vm132_vm2, %v554_v8  ;;  %v942_v8 = vld [vmem:[#allocation5 + $0xa8] sm:$0xff] }
 0x40f   :  { %963 = vmatpush.msra.mxu2 %v942_v8 }
 0x418   :  { %v528_v9 = vpop.f32.mrf.mxu1 }
 0x419   :  { %2055 = vmatmul.msk.f32.vlgmr.msra.gmra.mxu1 %vm132_vm2, %v528_v9 }
 0x426   :  { %v606_v11 = vpop.f32.mrf.mxu3 }
 0x427   :  { %2058 = vmatmul.msk.f32.vlgmr.msra.gmra.mxu3 %vm132_vm2, %v606_v11 }
 0x430   :  { %v632_v13 = vpop.f32.mrf.mxu1 }
 0x431   :  { %2059 = vmatmul.msk.f32.vlgmr.msrb.gmra.mxu1 %vm132_vm2, %v632_v13  ;;  %v2156_v13 = vld [vmem:[#allocation5 + $0xc0] ss:$0 sm:$0xff] }
 0x473   :  { %v705_v24 = vpop.f32.mrf.mxu3 }
 0x474   :  { %v734_v26 = vsel %vm86_vm1, %v705_v24, 0.0 }
 0x482   :  { %v682_v14 = vpop.f32.mrf.mxu2 }
 0x483   :  { %v659_v16 = vpop.f32.mrf.mxu0  ;;  %v732_v19 = vsel %vm86_vm1, %v682_v14, 0.0 }
 0x484   :  { %v731_v22 = vsel %vm86_vm1, %v659_v16, 0.0 }
 0x485   :  { %v733_v25 = vadd.f32 %v732_v19, %v731_v22 }
 0x487   :  { %v735_v28 = vadd.f32 %v734_v26, %v733_v25 }
 0x48b   :  { %v758_v34 = vpop.f32.mrf.mxu0 }
 0x48c   :  { %v830_v37 = vsel %vm86_vm1, %v758_v34, 0.0  ;;  %v940_v34 = vld [vmem:[#allocation5 + $0x98] sm:$0xff] }
 0x48f   :  { %v781_v18 = vpop.f32.mrf.mxu2 }
 0x490   :  { %v831_v35 = vsel %vm86_vm1, %v781_v18, 0.0  ;;  %v941_v18 = vld [vmem:[#allocation5 + $0xa0] sm:$0xff] }
 0x491   :  { %v832_v38 = vadd.f32 %v831_v35, %v830_v37  ;;  %964 = vmatpush.msra.mxu2 %v941_v18  ;;  %v939_v35 = vld [vmem:[#allocation5 + $0x90] sm:$0xff] }
 0x493   :  { %965 = vmatpush.msra.mxu2 %v940_v34 }
 0x495   :  { %966 = vmatpush.msra.mxu2 %v939_v35 }
 0x496   :  { %v728_v27 = vpop.f32.mrf.mxu1 }
 0x497   :  { %v736_v30 = vsel %vm86_vm1, %v728_v27, 0.0 }
 0x498   :  { %v737_v31 = vadd.f32 %v736_v30, %v735_v28 }
 0x49a   :  { %v839_v32 = vadd.f32 %v2154_v29, %v737_v31 }
 0x49c   :  { %v841_v33 = vadd.f32 %v839_v32, %v2368_v10 }
 0x49e   :  { %v845_v15 = vsel %vm86_vm1, %v841_v33, 0.0 }
 0x49f   :  { %846 = vadd.xlane.f32.xlu0 %v845_v15 }
 0x4aa   :  { %v804_v36 = vpop.f32.mrf.mxu3 }
 0x4ab   :  { %v833_v17 = vsel %vm86_vm1, %v804_v36, 0.0  ;;  %v2157_v36 = vld [vmem:[#allocation5 + $0x88] ss:$0 sm:$0xff] }
 0x4ac   :  { %v834_v39 = vadd.f32 %v833_v17, %v832_v38 }
 0x4ae   :  { %v827_v20 = vpop.f32.mrf.mxu1 }
 0x4af   :  { %v835_v21 = vsel %vm86_vm1, %v827_v20, 0.0 }
 0x4b0   :  { %v836_v40 = vadd.f32 %v835_v21, %v834_v39 }
 0x4b2   :  { %v840_v41 = vadd.f32 %v2154_v29, %v836_v40  ;;  %v2158_v40 = vld [vmem:[#allocation5 + $0xb0] ss:$0 sm:$0xff] }
 0x4b4   :  { %v842_v10 = vadd.f32 %v840_v41, %v2372_v12 }
 0x4b6   :  { %v848_v42 = vsel %vm86_vm1, %v842_v10, 0.0 }
 0x4b7   :  { %849 = vadd.xlane.f32.xlu2 %v848_v42 }
 0x512   :  { %v847_v49 = vpop.xlane.xlu0 %846 }
 0x513   :  { %v858_v50 = vmul.f32 %v2521_v48, %v847_v49 }
 0x515   :  { %v860_v51 = vsub.f32 %v841_v33, %v858_v50 }
 0x517   :  { %v862_v53 = vmul.f32 %v860_v51, %v860_v51 }
 0x519   :  { %v864_v12 = vsel %vm86_vm1, %v862_v53, 0.0 }
 0x51a   :  { %865 = vadd.xlane.f32.xlu1 %v864_v12 }
 0x52a   :  { %v850_v54 = vpop.xlane.xlu2 %849 }
 0x52b   :  { %v859_v55 = vmul.f32 %v2521_v48, %v850_v54 }
 0x52d   :  { %v861_v56 = vsub.f32 %v842_v10, %v859_v55 }
 0x52f   :  { %v863_v52 = vmul.f32 %v861_v56, %v861_v56 }
 0x531   :  { %v867_v57 = vsel %vm86_vm1, %v863_v52, 0.0 }
 0x532   :  { %868 = vadd.xlane.f32.xlu0 %v867_v57  ;;  %v1031_v57 = vld [vmem:[#allocation5 + $0xf0] sm:$0xff] }
 0x533   :  { %1052 = vmatpush.msrb.mxu3 %v1031_v57 }
 0x535   :  { %1053 = vmatpush.msrb.mxu3 %v1030_v58 }
 0x537   :  { %1054 = vmatpush.msrb.mxu3 %v1029_v59 }
 0x539   :  { %1055 = vmatpush.msrb.mxu3 %v1028_v60 }
 0x58d   :  { %v866_v62 = vpop.xlane.xlu1 %865 }
 0x58e   :  { %v870_v63 = vmul.f32 %v866_v62, %v2521_v48 }
 0x590   :  { %v872_v0 = vadd.f32 1e-05, %v870_v63 }
 0x592   :  { %2204 = vrsqrt.f32 %v872_v0  ;;  %vm880_vm5 = vweird.f32 %v872_v0 }
 0x598   :  { %v2205_v1 = vpop.eup %2204 }
 0x599   :  { %v875_v2 = vmul.f32 %v2205_v1, %v872_v0  ;;  %vm881_vm4 = vweird.f32 %v2205_v1 }
 0x59a   :  { %vm882_vm6 = vmor %vm880_vm5, %vm881_vm4 }
 0x59b   :  { %v876_v3 = vmul.f32 %v2205_v1, %v875_v2 }
 0x59d   :  { %v877_v4 = vmul.f32 0.5, %v876_v3 }
 0x59f   :  { %v878_v5 = vsub.f32 1.5, %v877_v4 }
 0x5a1   :  { %v879_v6 = vmul.f32 %v2205_v1, %v878_v5 }
 0x5a3   :  { %v883_v9 = vsel %vm882_vm6, %v2205_v1, %v879_v6  ;;  %v2159_v6 = vld [vmem:[#allocation5 + $0xc8] ss:$0 sm:$0xff] }
 0x5a4   :  { %v894_v11 = vmul.f32 %v883_v9, %v860_v51  ;;  %v2160_v9 = vld [vmem:[#allocation5 + $0xd0] ss:$0 sm:$0xff] }
 0x5a5   :  { %v869_v14 = vpop.xlane.xlu0 %868 }
 0x5a6   :  { %v897_v16 = vmul.f32 %v2155_v7, %v894_v11  ;;  %v871_v19 = vmul.f32 %v869_v14, %v2521_v48 }
 0x5a8   :  { %v873_v22 = vadd.f32 1e-05, %v871_v19  ;;  %v900_v24 = vadd.f32 %v2156_v13, %v897_v16 }
 0x5aa   :  { %2206 = vrsqrt.f32 %v873_v22  ;;  %2060 = vmatmul.msk.f32.vlgmr.msra.gmra.mxu0 %vm86_vm1, %v900_v24  ;;  %vm890_vm8 = vweird.f32 %v873_v22 }
 0x5b0   :  { %v2207_v25 = vpop.eup %2206 }
 0x5b1   :  { %v885_v26 = vmul.f32 %v2207_v25, %v873_v22  ;;  %vm891_vm7 = vweird.f32 %v2207_v25 }
 0x5b2   :  { %vm892_vm9 = vmor %vm890_vm8, %vm891_vm7 }
 0x5b3   :  { %v886_v27 = vmul.f32 %v2207_v25, %v885_v26 }
 0x5b5   :  { %v887_v28 = vmul.f32 0.5, %v886_v27 }
 0x5b7   :  { %v888_v29 = vsub.f32 1.5, %v887_v28 }
 0x5b9   :  { %v889_v30 = vmul.f32 %v2207_v25, %v888_v29 }
 0x5bb   :  { %v893_v31 = vsel %vm892_vm9, %v2207_v25, %v889_v30 }
 0x5bc   :  { %v895_v32 = vmul.f32 %v893_v31, %v861_v56 }
 0x5be   :  { %v898_v33 = vmul.f32 %v2155_v7, %v895_v32 }
 0x5c0   :  { %v901_v15 = vadd.f32 %v2156_v13, %v898_v33  ;;  %v2161_v33 = vld [vmem:[#allocation5 + $0xf8] ss:$0 sm:$0xff] }
 0x5c2   :  { %2061 = vmatmul.msk.f32.gmra.mxu0 %vm86_vm1, %v901_v15 }
 0x627   :  { %v931_v37 = vpop.f32.mrf.mxu0 }
 0x628   :  { %v932_v17 = vadd.f32 %v2157_v36, %v931_v37 }
 0x62a   :  { %v937_v38 = vmax.f32 %v932_v17, 0.0 }
 0x62c   :  { %2062 = vmatmul.msk.f32.vlgmr.msra.gmra.mxu2 %vm86_vm1, %v937_v38 }
 0x63f   :  { %v934_v39 = vpop.f32.mrf.mxu0 }
 0x640   :  { %v935_v20 = vadd.f32 %v2157_v36, %v934_v39 }
 0x642   :  { %v938_v21 = vmax.f32 %v935_v20, 0.0 }
 0x644   :  { %2063 = vmatmul.msk.f32.gmra.mxu2 %vm86_vm1, %v938_v21 }
 0x6af   :  { %v968_v41 = vpop.f32.mrf.mxu2 }
 0x6b0   :  { %v969_v10 = vadd.f32 %v2158_v40, %v968_v41 }
 0x6b2   :  { %v974_v42 = vadd.f32 %v969_v10, %v900_v24 }
 0x6b4   :  { %v978_v43 = vsel %vm86_vm1, %v974_v42, 0.0 }
 0x6b5   :  { %979 = vadd.xlane.f32.xlu2 %v978_v43 }
 0x6c7   :  { %v971_v23 = vpop.f32.mrf.mxu2 }
 0x6c8   :  { %v972_v44 = vadd.f32 %v2158_v40, %v971_v23 }
 0x6ca   :  { %v975_v45 = vadd.f32 %v972_v44, %v901_v15 }
 0x6cc   :  { %v981_v46 = vsel %vm86_vm1, %v975_v45, 0.0 }
 0x6cd   :  { %982 = vadd.xlane.f32.xlu0 %v981_v46 }
 0x728   :  { %v980_v47 = vpop.xlane.xlu2 %979 }
 0x729   :  { %v984_v49 = vmul.f32 %v980_v47, %v2521_v48 }
 0x72b   :  { %v986_v50 = vsub.f32 %v974_v42, %v984_v49 }
 0x72d   :  { %v988_v51 = vmul.f32 %v986_v50, %v986_v50 }
 0x72f   :  { %v990_v53 = vsel %vm86_vm1, %v988_v51, 0.0 }
 0x730   :  { %991 = vadd.xlane.f32.xlu2 %v990_v53 }
 0x740   :  { %v983_v12 = vpop.xlane.xlu0 %982 }
 0x741   :  { %v985_v54 = vmul.f32 %v983_v12, %v2521_v48 }
 0x743   :  { %v987_v55 = vsub.f32 %v975_v45, %v985_v54 }
 0x745   :  { %v989_v56 = vmul.f32 %v987_v55, %v987_v55 }
 0x747   :  { %v993_v52 = vsel %vm86_vm1, %v989_v56, 0.0 }
 0x748   :  { %994 = vadd.xlane.f32.xlu0 %v993_v52 }
 0x7a3   :  { %v992_v61 = vpop.xlane.xlu2 %991 }
 0x7a4   :  { %v996_v62 = vmul.f32 %v992_v61, %v2521_v48 }
 0x7a6   :  { %v998_v63 = vadd.f32 1e-05, %v996_v62 }
 0x7a8   :  { %2208 = vrsqrt.f32 %v998_v63  ;;  %vm1006_vm11 = vweird.f32 %v998_v63 }
 0x7ae   :  { %v2209_v0 = vpop.eup %2208 }
 0x7af   :  { %v1001_v1 = vmul.f32 %v2209_v0, %v998_v63  ;;  %vm1007_vm10 = vweird.f32 %v2209_v0 }
 0x7b0   :  { %vm1008_vm12 = vmor %vm1006_vm11, %vm1007_vm10 }
 0x7b1   :  { %v1002_v2 = vmul.f32 %v2209_v0, %v1001_v1 }
 0x7b3   :  { %v1003_v3 = vmul.f32 0.5, %v1002_v2 }
 0x7b5   :  { %v1004_v4 = vsub.f32 1.5, %v1003_v3 }
 0x7b7   :  { %v1005_v5 = vmul.f32 %v2209_v0, %v1004_v4 }
 0x7b9   :  { %v1009_v7 = vsel %vm1008_vm12, %v2209_v0, %v1005_v5 }
 0x7ba   :  { %v1020_v8 = vmul.f32 %v1009_v7, %v986_v50 }
 0x7bb   :  { %v995_v11 = vpop.xlane.xlu0 %994 }
 0x7bc   :  { %v1023_v13 = vmul.f32 %v2159_v6, %v1020_v8  ;;  %v997_v14 = vmul.f32 %v995_v11, %v2521_v48 }
 0x7be   :  { %v999_v16 = vadd.f32 1e-05, %v997_v14  ;;  %v2541_v19 = vadd.f32 %v2160_v9, %v1023_v13 }
 0x7c0   :  { %2210 = vrsqrt.f32 %v999_v16  ;;  %2064 = vmatmul.msk.f32.vlgmr.msrb.gmra.mxu3 %vm86_vm1, %v2541_v19  ;;  %vm1016_vm14 = vweird.f32 %v999_v16 }
 0x7c6   :  { %v2211_v22 = vpop.eup %2210 }
 0x7c7   :  { %v1011_v24 = vmul.f32 %v2211_v22, %v999_v16  ;;  %vm1017_vm13 = vweird.f32 %v2211_v22 }
 0x7c8   :  { %vm1018_vm15 = vmor %vm1016_vm14, %vm1017_vm13 }
 0x7c9   :  { %v1012_v25 = vmul.f32 %v2211_v22, %v1011_v24 }
 0x7cb   :  { %v1013_v26 = vmul.f32 0.5, %v1012_v25 }
 0x7cd   :  { %v1014_v27 = vsub.f32 1.5, %v1013_v26 }
 0x7cf   :  { %v1015_v28 = vmul.f32 %v2211_v22, %v1014_v27 }
 0x7d1   :  { %v1019_v29 = vsel %vm1018_vm15, %v2211_v22, %v1015_v28 }
 0x7d2   :  { %v1021_v30 = vmul.f32 %v1019_v29, %v987_v55 }
 0x7d4   :  { %v1024_v31 = vmul.f32 %v2159_v6, %v1021_v30 }
 0x7d6   :  { %v2545_v32 = vadd.f32 %v2160_v9, %v1024_v31 }
 0x7d8   :  { %2065 = vmatmul.msk.f32.gmra.mxu3 %vm86_vm1, %v2545_v32 }
 0x843   :  { %v1057_v15 = vpop.f32.mrf.mxu3 }
 0x844   :  { %v2549_v18 = vadd.f32 %v2161_v33, %v1057_v15 }
 0x846   :  { %1068 = vrot.lane.b32.xlu2 %v2549_v18, %s2334_s0  ;;  %1064 = vrot.lane.b32.xlu0 %v2549_v18, %s2335_s1 }
 0x84e   :  { %1066 = vrot.lane.b32.xlu2 %v2549_v18, %s2336_s21 }
 0x85b   :  { %v1060_v34 = vpop.f32.mrf.mxu3 }
 0x85c   :  { %v2557_v35 = vadd.f32 %v2161_v33, %v1060_v34 }
 0x85e   :  { %1071 = vrot.lane.b32.xlu0 %v2557_v35, %s2335_s1  ;;  %1075 = vrot.lane.b32.xlu1 %v2557_v35, %s2334_s0 }
 0x866   :  { %1077 = vrot.lane.b32.xlu0 %v2549_v18, %s2337_s22  ;;  %1073 = vrot.lane.b32.xlu1 %v2557_v35, %s2336_s21 }
 0x86e   :  { %1181 = vrot.lane.b32.xlu1 %v2557_v35, %s2337_s22 }
 0x8a0   :  { %v2569_v36 = vpop.permute.xlu2 %1068 }
 0x8a1   :  { %1155 = vrot.lane.b32.xlu2 %v2569_v36, %s2337_s22  ;;  %v2132_v7 = vpack.i.bf16 %v2569_v36, %v2549_v18 }
 0x8a8   :  { %v2573_v37 = vpop.permute.xlu2 %1066 }
 0x8a9   :  { %1129 = vrot.lane.b32.xlu1 %v2573_v37, %s2337_s22 }
 0x8b8   :  { %v2577_v17 = vpop.permute.xlu0 %1064 }
 0x8b9   :  { %1103 = vrot.lane.b32.xlu0 %v2577_v17, %s2337_s22 }
 0x8d0   :  { %v2581_v38 = vpop.permute.xlu1 %1075  ;;  %v2583_v39 = vpop.permute.xlu0 %1071 }
 0x8d1   :  { %1259 = vrot.lane.b32.xlu2 %v2581_v38, %s2337_s22  ;;  %v2142_v8 = vpack.i.bf16 %v2573_v37, %v2581_v38 }
 0x8d8   :  { %v2587_v20 = vpop.permute.xlu1 %1073  ;;  %v1078_v21 = vpop.permute.xlu0 %1077 }
 0x8d9   :  { %1233 = vrot.lane.b32.xlu0 %v2587_v20, %s2337_s22  ;;  %1207 = vrot.lane.b32.xlu2 %v2583_v39, %s2337_s22  ;;  %v2147_v9 = vpack.i.bf16 %v2587_v20, %v2583_v39 }
 0x8da   :  { %2066 = vmatpush.xpose.msk.msra.mxu1 %vm132_vm2, %v1078_v21 }
 0x8dd   :  { %2067 = vmatmul.msk.f32.vlgmr.msra.gmra.mxu1 %vm132_vm2, %v2549_v18 }
 0x8e0   :  { %v1182_v40 = vpop.permute.xlu1 %1181 }
 0x8e1   :  { %2074 = vmatpush.xpose.msk.msra.mxu3 %vm132_vm2, %v1182_v40 }
 0x8e4   :  { %2075 = vmatmul.msk.f32.vlgmr.msra.gmra.mxu3 %vm132_vm2, %v2557_v35 }
 0x8fb   :  { %v1156_v41 = vpop.permute.xlu2 %1155 }
 0x8fc   :  { %2072 = vmatpush.xpose.msk.msrb.mxu2 %vm132_vm2, %v1156_v41 }
 0x8ff   :  { %2073 = vmatmul.msk.f32.vlgmr.msrb.gmra.mxu2 %vm132_vm2, %v2569_v36 }
 0x91b   :  { %v1130_v10 = vpop.permute.xlu1 %1129 }
 0x91c   :  { %2070 = vmatpush.xpose.msk.msrb.mxu0 %vm132_vm2, %v1130_v10 }
 0x91f   :  { %2071 = vmatmul.msk.f32.vlgmr.msrb.gmra.mxu0 %vm132_vm2, %v2573_v37 }
 0x92b   :  { %v1260_v42 = vpop.permute.xlu2 %1259  ;;  %v1104_v43 = vpop.permute.xlu0 %1103 }
 0x92c   :  { %2068 = vmatpush.xpose.msk.msrb.mxu1 %vm132_vm2, %v1104_v43  ;;  %2080 = vmatpush.xpose.msk.msra.mxu2 %vm132_vm2, %v1260_v42 }
 0x92f   :  { %2069 = vmatmul.msk.f32.vlgmr.msrb.gmra.mxu1 %vm132_vm2, %v2577_v17  ;;  %2081 = vmatmul.msk.f32.vlgmr.msra.gmra.mxu2 %vm132_vm2, %v2581_v38 }
 0x933   :  { %v1208_v23 = vpop.permute.xlu2 %1207 }
 0x934   :  { %2076 = vmatpush.xpose.msk.msra.mxu1 %vm132_vm2, %v1208_v23 }
 0x937   :  { %2077 = vmatmul.msk.f32.vlgmr.msra.gmra.mxu1 %vm132_vm2, %v2583_v39 }
 0x94b   :  { %v1234_v44 = vpop.permute.xlu0 %1233 }
 0x94c   :  { %2078 = vmatpush.xpose.msk.msra.mxu0 %vm132_vm2, %v1234_v44 }
 0x94f   :  { %2079 = vmatmul.msk.f32.vlgmr.msra.gmra.mxu0 %vm132_vm2, %v2587_v20 }
 0x95a   :  { %v1100_v45 = vpop.f32.mrf.mxu1 }
 0x95b   :  { %v1285_v46 = vsel %vm132_vm2, %v1100_v45, -inf }
 0x95c   :  { %1286 = vmax.xlane.f32.xlu1 %v1285_v46 }
 0x967   :  { %v1204_v47 = vpop.f32.mrf.mxu3 }
 0x968   :  { %v1297_v49 = vsel %vm132_vm2, %v1204_v47, -inf }
 0x969   :  { %1298 = vmax.xlane.f32.xlu0 %v1297_v49 }
 0x982   :  { %v1178_v50 = vpop.f32.mrf.mxu2 }
 0x983   :  { %v1294_v51 = vsel %vm132_vm2, %v1178_v50, -inf }
 0x984   :  { %1295 = vmax.xlane.f32.xlu2 %v1294_v51 }
 0x99c   :  { %v1152_v53 = vpop.f32.mrf.mxu0 }
 0x99d   :  { %v1291_v12 = vsel %vm132_vm2, %v1152_v53, -inf }
 0x99e   :  { %1292 = vmax.xlane.f32.xlu0 %v1291_v12 }
 0x9ac   :  { %v1126_v54 = vpop.f32.mrf.mxu1 }
 0x9ad   :  { %v1288_v55 = vsel %vm132_vm2, %v1126_v54, -inf }
 0x9ae   :  { %1289 = vmax.xlane.f32.xlu1 %v1288_v55  ;;  %v2137_v55 = vpack.i.bf16 %v2577_v17, %v2557_v35 }
 0x9b2   :  { %v1282_v61 = vpop.f32.mrf.mxu2 }
 0x9b3   :  { %v1306_v63 = vsel %vm132_vm2, %v1282_v61, -inf }
 0x9b4   :  { %v1230_v56 = vpop.f32.mrf.mxu1 }
 0x9b5   :  { %v1300_v52 = vsel %vm132_vm2, %v1230_v56, -inf }
 0x9b6   :  { %1301 = vmax.xlane.f32.xlu1 %v1300_v52 }
 0x9cc   :  { %v1256_v57 = vpop.f32.mrf.mxu0 }
 0x9cd   :  { %v1303_v58 = vsel %vm132_vm2, %v1256_v57, -inf }
 0x9ce   :  { %1304 = vmax.xlane.f32.xlu2 %v1303_v58 }
 0x9cf   :  { %v1287_v59 = vpop.xlane.xlu1 %1286 }
 0x9d0   :  { %v1309_v60 = vsub.f32 %v1100_v45, %v1287_v59 }
 0x9d2   :  { %v1317_v62 = vmul.f32 1.442695, %v1309_v60 }
 0x9d4   :  { %2212 = vpow2.f32 %v1317_v62 }
 0x9d6   :  { %1307 = vmax.xlane.f32.xlu2 %v1306_v63 }
 0x9da   :  { %v2625_v0 = vpop.eup %2212 }
 0x9db   :  { %v1333_v1 = vsel %vm132_vm2, %v2625_v0, 0.0 }
 0x9dc   :  { %1334 = vadd.xlane.f32.xlu0 %v1333_v1  ;;  %v1299_v2 = vpop.xlane.xlu0 %1298 }
 0x9dd   :  { %v1313_v3 = vsub.f32 %v1204_v47, %v1299_v2 }
 0x9df   :  { %v1325_v4 = vmul.f32 1.442695, %v1313_v3 }
 0x9e1   :  { %2214 = vpow2.f32 %v1325_v4 }
 0x9e7   :  { %v2629_v5 = vpop.eup %2214 }
 0x9e8   :  { %v1345_v6 = vsel %vm132_vm2, %v2629_v5, 0.0 }
 0x9e9   :  { %1346 = vadd.xlane.f32.xlu2 %v1345_v6 }
 0x9f0   :  { %2133 = vrot.lane.b32.xlu0 %v2132_v7, %s2338_s23 }
 0x9f7   :  { %v1296_v11 = vpop.xlane.xlu2 %1295 }
 0x9f8   :  { %2143 = vrot.lane.b32.xlu0 %v2142_v8, %s2338_s23  ;;  %v1312_v16 = vsub.f32 %v1178_v50, %v1296_v11 }
 0x9fa   :  { %v1323_v24 = vmul.f32 1.442695, %v1312_v16 }
 0xa00   :  { %2148 = vrot.lane.b32.xlu0 %v2147_v9, %s2338_s23 }
 0xa11   :  { %v1293_v25 = vpop.xlane.xlu0 %1292 }
 0xa12   :  { %v1311_v27 = vsub.f32 %v1152_v53, %v1293_v25 }
 0xa14   :  { %v1321_v29 = vmul.f32 1.442695, %v1311_v27 }
 0xa21   :  { %v1290_v13 = vpop.xlane.xlu1 %1289 }
 0xa22   :  { %v1310_v14 = vsub.f32 %v1126_v54, %v1290_v13 }
 0xa24   :  { %v1319_v22 = vmul.f32 1.442695, %v1310_v14 }
 0xa26   :  { %2216 = vpow2.f32 %v1319_v22  ;;  %v1581_v22 = vld [vmem:[#allocation5 + $0x100] sm:$0xff] }
 0xa27   :  { %2218 = vpow2.f32 %v1323_v24 }
 0xa28   :  { %2220 = vpow2.f32 %v1321_v29  ;;  %v1582_v29 = vld [vmem:[#allocation5 + $0x108] sm:$0xff] }
 0xa29   :  { %v1302_v30 = vpop.xlane.xlu1 %1301 }
 0xa2a   :  { %v1314_v33 = vsub.f32 %v1230_v56, %v1302_v30 }
 0xa2c   :  { %v2642_v26 = vpop.eup %2216  ;;  %v1327_v18 = vmul.f32 1.442695, %v1314_v33 }
 0xa2d   :  { %v1336_v28 = vsel %vm132_vm2, %v2642_v26, 0.0  ;;  %v2219_v31 = vpop.eup %2218 }
 0xa2e   :  { %1337 = vadd.xlane.f32.xlu1 %v1336_v28  ;;  %v1342_v15 = vsel %vm132_vm2, %v2219_v31, 0.0  ;;  %v2221_v34 = vpop.eup %2220  ;;  %2222 = vpow2.f32 %v1327_v18  ;;  %v1583_v28 = vld [vmem:[#allocation5 + $0x110] sm:$0xff] }
 0xa2f   :  { %v1339_v36 = vsel %vm132_vm2, %v2221_v34, 0.0 }
 0xa34   :  { %v2648_v38 = vpop.eup %2222 }
 0xa35   :  { %v1348_v21 = vsel %vm132_vm2, %v2648_v38, 0.0 }
 0xa36   :  { %1343 = vadd.xlane.f32.xlu1 %v1342_v15 }
 0xa3e   :  { %1340 = vadd.xlane.f32.xlu1 %v1339_v36 }
 0xa41   :  { %v1305_v37 = vpop.xlane.xlu2 %1304 }
 0xa42   :  { %v1315_v39 = vsub.f32 %v1256_v57, %v1305_v37 }
 0xa44   :  { %v1329_v20 = vmul.f32 1.442695, %v1315_v39 }
 0xa46   :  { %2224 = vpow2.f32 %v1329_v20  ;;  %1349 = vadd.xlane.f32.xlu1 %v1348_v21 }
 0xa49   :  { %v1308_v40 = vpop.xlane.xlu2 %1307 }
 0xa4a   :  { %v1316_v41 = vsub.f32 %v1282_v61, %v1308_v40 }
 0xa4c   :  { %v2225_v10 = vpop.eup %2224  ;;  %v1331_v42 = vmul.f32 1.442695, %v1316_v41 }
 0xa4d   :  { %v1351_v43 = vsel %vm132_vm2, %v2225_v10, 0.0 }
 0xa4e   :  { %2226 = vpow2.f32 %v1331_v42  ;;  %1352 = vadd.xlane.f32.xlu1 %v1351_v43  ;;  %v2162_v43 = vld [vmem:[#allocation5 + $0x120] ss:$0 sm:$0xff] }
 0xa4f   :  { %v1335_v45 = vpop.xlane.xlu0 %1334 }
 0xa50   :  { %2228 = vrcp.f32 %v1335_v45 }
 0xa54   :  { %v2227_v23 = vpop.eup %2226 }
 0xa55   :  { %v1354_v44 = vsel %vm132_vm2, %v2227_v23, 0.0 }
 0xa56   :  { %1355 = vadd.xlane.f32.xlu2 %v1354_v44  ;;  %v2229_v46 = vpop.eup %2228 }
 0xa57   :  { %v1365_v51 = vmul.f32 %v2229_v46, %v2625_v0 }
 0xa5c   :  { %v1347_v35 = vpop.xlane.xlu2 %1346 }
 0xa62   :  { %v2134_v47 = vpop.permute.xlu0 %2133 }
 0xa63   :  { %v2136_v49 = vunpack.i.h.bf16 %v2134_v47  ;;  %v2135_v50 = vunpack.i.l.bf16 %v2134_v47 }
 0xa65   :  { %1394 = vmatpush.msrb.mxu3 %v2135_v50  ;;  %1472 = vmatpush.msrb.mxu2 %v2136_v49 }
 0xa66   :  { %2082 = vmatmul.msk.f32.vlgmr.msrb.gmra.mxu3 %vm132_vm2, %v1365_v51 }
 0xa6a   :  { %v2144_v53 = vpop.permute.xlu0 %2143 }
 0xa6b   :  { %v2146_v12 = vunpack.i.h.bf16 %v2144_v53  ;;  %v2145_v54 = vunpack.i.l.bf16 %v2144_v53 }
 0xa6d   :  { %1446 = vmatpush.msrb.mxu0 %v2146_v12  ;;  %1576 = vmatpush.msra.mxu2 %v2145_v54 }
 0xa6e   :  { %2138 = vrot.lane.b32.xlu2 %v2137_v55, %s2338_s23 }
 0xa72   :  { %v2149_v56 = vpop.permute.xlu0 %2148 }
 0xa73   :  { %v2151_v52 = vunpack.i.h.bf16 %v2149_v56  ;;  %v2150_v24 = vunpack.i.l.bf16 %v2149_v56 }
 0xa75   :  { %1550 = vmatpush.msra.mxu0 %v2151_v52 }
 0xaa1   :  { %v1338_v57 = vpop.xlane.xlu1 %1337 }
 0xaa9   :  { %v1344_v58 = vpop.xlane.xlu1 %1343 }
 0xaaa   :  { %2230 = vrcp.f32 %v1344_v58 }
 0xab0   :  { %v2231_v59 = vpop.eup %2230 }
 0xab1   :  { %v1368_v60 = vmul.f32 %v2231_v59, %v2219_v31  ;;  %v1341_v61 = vpop.xlane.xlu1 %1340 }
 0xab2   :  { %2232 = vrcp.f32 %v1341_v61 }
 0xab3   :  { %2085 = vmatmul.msk.f32.vlgmr.msrb.gmra.mxu2 %vm132_vm2, %v1368_v60 }
 0xab8   :  { %v2233_v62 = vpop.eup %2232 }
 0xab9   :  { %v1367_v63 = vmul.f32 %v2233_v62, %v2221_v34  ;;  %v1350_v0 = vpop.xlane.xlu1 %1349 }
 0xabb   :  { %2084 = vmatmul.msk.f32.vlgmr.msrb.gmra.mxu0 %vm132_vm2, %v1367_v63 }
 0xabc   :  { %1649 = vmatpush.msrb.mxu0 %v1583_v28 }
 0xac1   :  { %v1353_v17 = vpop.xlane.xlu1 %1352 }
 0xac2   :  { %2234 = vrcp.f32 %v1353_v17 }
 0xac3   :  { %2236 = vrcp.f32 %v1347_v35 }
 0xac4   :  { %2238 = vrcp.f32 %v1338_v57 }
 0xac8   :  { %v2235_v1 = vpop.eup %2234 }
 0xac9   :  { %v1371_v2 = vmul.f32 %v2235_v1, %v2225_v10  ;;  %v1356_v3 = vpop.xlane.xlu2 %1355  ;;  %v2237_v4 = vpop.eup %2236 }
 0xaca   :  { %2240 = vrcp.f32 %v1356_v3  ;;  %v2239_v6 = vpop.eup %2238  ;;  %v1369_v14 = vmul.f32 %v2237_v4, %v2629_v5 }
 0xacb   :  { %2088 = vmatmul.msk.f32.vlgmr.msra.gmra.mxu0 %vm132_vm2, %v1371_v2  ;;  %2242 = vrcp.f32 %v1350_v0  ;;  %v1366_v16 = vmul.f32 %v2239_v6, %v2642_v26  ;;  %v1584_v26 = vld [vmem:[#allocation5 + $0x118] sm:$0xff] }
 0xacc   :  { %1672 = vmatpush.msrb.mxu2 %v1584_v26  ;;  %1748 = vmatpush.msra.mxu0 %v1583_v28  ;;  %v1843_v6 = vld [vmem:[#allocation5 + $0x138] sm:$0xff] }
 0xad0   :  { %v2241_v7 = vpop.eup %2240 }
 0xad1   :  { %v1372_v8 = vmul.f32 %v2241_v7, %v2227_v23  ;;  %v2139_v9 = vpop.permute.xlu2 %2138  ;;  %v2243_v25 = vpop.eup %2242  ;;  %v1842_v7 = vld [vmem:[#allocation5 + $0x130] sm:$0xff] }
 0xad2   :  { %v2141_v11 = vunpack.i.h.bf16 %v2139_v9  ;;  %v2140_v13 = vunpack.i.l.bf16 %v2139_v9  ;;  %v1370_v27 = vmul.f32 %v2243_v25, %v2648_v38 }
 0xad3   :  { %2089 = vmatmul.msk.f32.vlgmr.msra.gmra.mxu2 %vm132_vm2, %v1372_v8  ;;  %v1841_v8 = vld [vmem:[#allocation5 + $0x128] sm:$0xff] }
 0xad4   :  { %1420 = vmatpush.msrb.mxu1 %v2141_v11  ;;  %1498 = vmatpush.msra.mxu3 %v2140_v13 }
 0xad5   :  { %2083 = vmatmul.msk.f32.vlgmr.msrb.gmra.mxu1 %vm132_vm2, %v1366_v16  ;;  %2086 = vmatmul.msk.f32.vlgmr.msra.gmra.mxu3 %vm132_vm2, %v1369_v14  ;;  %v1881_v14 = vld [vmem:[#allocation5 + $0x168] sm:$0xff] }
 0xad6   :  { %1524 = vmatpush.msra.mxu1 %v2150_v24  ;;  %1603 = vmatpush.msrb.mxu3 %v1581_v22 }
 0xad7   :  { %1771 = vmatpush.msra.mxu2 %v1584_v26 }
 0xad8   :  { %1702 = vmatpush.msra.mxu3 %v1581_v22  ;;  %1626 = vmatpush.msrb.mxu1 %v1582_v29 }
 0xadd   :  { %2087 = vmatmul.msk.f32.vlgmr.msra.gmra.mxu1 %vm132_vm2, %v1370_v27 }
 0xade   :  { %1725 = vmatpush.msra.mxu1 %v1582_v29 }
 0xae9   :  { %v1396_v5 = vpop.f32.mrf.mxu3 }
 0xaea   :  { %2090 = vmatmul.msk.f32.vlgmr.msrb.gmra.mxu3 %vm132_vm2, %v1396_v5 }
 0xb36   :  { %v1474_v30 = vpop.f32.mrf.mxu2 }
 0xb37   :  { %2093 = vmatmul.msk.f32.vlgmr.msrb.gmra.mxu2 %vm132_vm2, %v1474_v30  ;;  %v2163_v30 = vld [vmem:[#allocation5 + $0x178] ss:$0 sm:$0xff] }
 0xb38   :  { %v1448_v31 = vpop.f32.mrf.mxu0 }
 0xb39   :  { %2092 = vmatmul.msk.f32.vlgmr.msrb.gmra.mxu0 %vm132_vm2, %v1448_v31 }
 0xb48   :  { %v1552_v33 = vpop.f32.mrf.mxu0 }
 0xb49   :  { %2096 = vmatmul.msk.f32.vlgmr.msra.gmra.mxu0 %vm132_vm2, %v1552_v33 }
 0xb52   :  { %v1422_v15 = vpop.f32.mrf.mxu1 }
 0xb53   :  { %2091 = vmatmul.msk.f32.vlgmr.msrb.gmra.mxu1 %vm132_vm2, %v1422_v15 }
 0xb54   :  { %1902 = vmatpush.msrb.mxu1 %v1881_v14 }
 0xb56   :  { %v1578_v18 = vpop.f32.mrf.mxu2 }
 0xb57   :  { %2097 = vmatmul.msk.f32.vlgmr.msra.gmra.mxu2 %vm132_vm2, %v1578_v18  ;;  %v2164_v18 = vld [vmem:[#allocation5 + $0x180] ss:$0 sm:$0xff] }
 0xb58   :  { %v1500_v34 = vpop.f32.mrf.mxu3 }
 0xb59   :  { %2094 = vmatmul.msk.f32.vlgmr.msra.gmra.mxu3 %vm132_vm2, %v1500_v34 }
 0xb5a   :  { %v1526_v36 = vpop.f32.mrf.mxu1 }
 0xb5b   :  { %2095 = vmatmul.msk.f32.vlgmr.msra.gmra.mxu1 %vm132_vm2, %v1526_v36 }
 0xb6d   :  { %v1605_v37 = vpop.f32.mrf.mxu3 }
 0xb6e   :  { %v1677_v20 = vsel %vm86_vm1, %v1605_v37, 0.0 }
 0xbb6   :  { %v1651_v38 = vpop.f32.mrf.mxu0 }
 0xbb7   :  { %v1680_v10 = vsel %vm86_vm1, %v1651_v38, 0.0 }
 0xbba   :  { %v1674_v40 = vpop.f32.mrf.mxu2 }
 0xbbb   :  { %v1682_v23 = vsel %vm86_vm1, %v1674_v40, 0.0 }
 0xbc6   :  { %v1750_v49 = vpop.f32.mrf.mxu0 }
 0xbc7   :  { %v1779_v56 = vsel %vm86_vm1, %v1750_v49, 0.0 }
 0xbd0   :  { %v1628_v39 = vpop.f32.mrf.mxu1 }
 0xbd1   :  { %v1678_v21 = vsel %vm86_vm1, %v1628_v39, 0.0 }
 0xbd2   :  { %v1679_v41 = vadd.f32 %v1678_v21, %v1677_v20 }
 0xbd4   :  { %v1681_v42 = vadd.f32 %v1680_v10, %v1679_v41 }
 0xbd6   :  { %v1683_v44 = vadd.f32 %v1682_v23, %v1681_v42  ;;  %v1879_v23 = vld [vmem:[#allocation5 + $0x158] sm:$0xff] }
 0xbd8   :  { %v1785_v45 = vadd.f32 %v2162_v43, %v1683_v44  ;;  %v1727_v46 = vpop.f32.mrf.mxu1  ;;  %v1878_v44 = vld [vmem:[#allocation5 + $0x150] sm:$0xff] }
 0xbd9   :  { %v1777_v53 = vsel %vm86_vm1, %v1727_v46, 0.0 }
 0xbda   :  { %v1787_v47 = vadd.f32 %v1785_v45, %v2541_v19  ;;  %v1773_v54 = vpop.f32.mrf.mxu2  ;;  %v2165_v45 = vld [vmem:[#allocation5 + $0x148] ss:$0 sm:$0xff] }
 0xbdb   :  { %v1781_v57 = vsel %vm86_vm1, %v1773_v54, 0.0 }
 0xbdc   :  { %v1704_v50 = vpop.f32.mrf.mxu3  ;;  %v1791_v51 = vsel %vm86_vm1, %v1787_v47, 0.0 }
 0xbdd   :  { %v1776_v12 = vsel %vm86_vm1, %v1704_v50, 0.0  ;;  %1792 = vadd.xlane.f32.xlu1 %v1791_v51 }
 0xbde   :  { %v1778_v55 = vadd.f32 %v1777_v53, %v1776_v12  ;;  %v2166_v12 = vld [vmem:[#allocation5 + $0x170] ss:$0 sm:$0xff] }
 0xbe0   :  { %v1780_v52 = vadd.f32 %v1779_v56, %v1778_v55 }
 0xbe2   :  { %v1782_v58 = vadd.f32 %v1781_v57, %v1780_v52 }
 0xbe4   :  { %v1786_v59 = vadd.f32 %v2162_v43, %v1782_v58  ;;  %v1880_v43 = vld [vmem:[#allocation5 + $0x160] sm:$0xff] }
 0xbe5   :  { %1903 = vmatpush.msrb.mxu1 %v1880_v43 }
 0xbe6   :  { %v1788_v19 = vadd.f32 %v1786_v59, %v2545_v32  ;;  %v1844_v32 = vld [vmem:[#allocation5 + $0x140] sm:$0xff] }
 0xbe7   :  { %1865 = vmatpush.msrb.mxu3 %v1844_v32  ;;  %1904 = vmatpush.msrb.mxu1 %v1879_v23  ;;  %v1969_v32 = vld [vmem:[#allocation5 + $0x1a8] sm:$0xff] }
 0xbe8   :  { %v1794_v60 = vsel %vm86_vm1, %v1788_v19, 0.0 }
 0xbe9   :  { %1795 = vadd.xlane.f32.xlu0 %v1794_v60  ;;  %1866 = vmatpush.msrb.mxu3 %v1843_v6  ;;  %v1968_v6 = vld [vmem:[#allocation5 + $0x1a0] sm:$0xff] }
 0xbea   :  { %1905 = vmatpush.msrb.mxu1 %v1878_v44 }
 0xbeb   :  { %1867 = vmatpush.msrb.mxu3 %v1842_v7  ;;  %v1967_v7 = vld [vmem:[#allocation5 + $0x198] sm:$0xff] }
 0xbed   :  { %1868 = vmatpush.msrb.mxu3 %v1841_v8 }
 0xc50   :  { %v1793_v61 = vpop.xlane.xlu1 %1792 }
 0xc51   :  { %v1797_v62 = vmul.f32 %v1793_v61, %v2521_v48 }
 0xc53   :  { %v1799_v63 = vsub.f32 %v1787_v47, %v1797_v62 }
 0xc55   :  { %v1801_v0 = vmul.f32 %v1799_v63, %v1799_v63 }
 0xc57   :  { %v1803_v35 = vsel %vm86_vm1, %v1801_v0, 0.0 }
 0xc58   :  { %1804 = vadd.xlane.f32.xlu2 %v1803_v35 }
 0xc5c   :  { %v1796_v17 = vpop.xlane.xlu0 %1795 }
 0xc5d   :  { %v1798_v1 = vmul.f32 %v1796_v17, %v2521_v48 }
 0xc5f   :  { %v1800_v2 = vsub.f32 %v1788_v19, %v1798_v1 }
 0xc61   :  { %v1802_v3 = vmul.f32 %v1800_v2, %v1800_v2 }
 0xc63   :  { %v1806_v4 = vsel %vm86_vm1, %v1802_v3, 0.0 }
 0xc64   :  { %1807 = vadd.xlane.f32.xlu1 %v1806_v4  ;;  %v1970_v4 = vld [vmem:[#allocation5 + $0x1b0] sm:$0xff] }
 0xc65   :  { %1991 = vmatpush.msrb.mxu0 %v1970_v4 }
 0xc67   :  { %1992 = vmatpush.msrb.mxu0 %v1969_v32 }
 0xc69   :  { %1993 = vmatpush.msrb.mxu0 %v1968_v6 }
 0xc6b   :  { %1994 = vmatpush.msrb.mxu0 %v1967_v7 }
 0xccb   :  { %v1805_v9 = vpop.xlane.xlu2 %1804 }
 0xccc   :  { %v1809_v11 = vmul.f32 %v1805_v9, %v2521_v48 }
 0xcce   :  { %v1811_v13 = vadd.f32 1e-05, %v1809_v11 }
 0xcd0   :  { %2244 = vrsqrt.f32 %v1811_v13  ;;  %vm1819_vm2 = vweird.f32 %v1811_v13 }
 0xcd6   :  { %v2245_v16 = vpop.eup %2244 }
 0xcd7   :  { %v1814_v22 = vmul.f32 %v2245_v16, %v1811_v13  ;;  %v1808_v24 = vpop.xlane.xlu1 %1807  ;;  %vm1820_vm0 = vweird.f32 %v2245_v16 }
 0xcd8   :  { %v1810_v25 = vmul.f32 %v1808_v24, %v2521_v48  ;;  %vm1821_vm3 = vmor %vm1819_vm2, %vm1820_vm0 }
 0xcd9   :  { %v1815_v27 = vmul.f32 %v2245_v16, %v1814_v22 }
 0xcda   :  { %v1812_v5 = vadd.f32 1e-05, %v1810_v25 }
 0xcdb   :  { %v1816_v26 = vmul.f32 0.5, %v1815_v27 }
 0xcdc   :  { %2246 = vrsqrt.f32 %v1812_v5  ;;  %vm1829_vm5 = vweird.f32 %v1812_v5 }
 0xcdd   :  { %v1817_v28 = vsub.f32 1.5, %v1816_v26 }
 0xcdf   :  { %v1818_v29 = vmul.f32 %v2245_v16, %v1817_v28  ;;  %v2167_v28 = vld [vmem:[#allocation5 + $0x188] ss:$0 sm:$0xff] }
 0xce1   :  { %v1822_v31 = vsel %vm1821_vm3, %v2245_v16, %v1818_v29 }
 0xce2   :  { %v2247_v33 = vpop.eup %2246  ;;  %v1833_v15 = vmul.f32 %v1822_v31, %v1799_v63 }
 0xce3   :  { %v1824_v34 = vmul.f32 %v2247_v33, %v1812_v5  ;;  %vm1830_vm4 = vweird.f32 %v2247_v33 }
 0xce4   :  { %v1836_v36 = vmul.f32 %v2163_v30, %v1833_v15  ;;  %vm1831_vm6 = vmor %vm1829_vm5, %vm1830_vm4 }
 0xce5   :  { %v1825_v37 = vmul.f32 %v2247_v33, %v1824_v34 }
 0xce6   :  { %v1839_v38 = vadd.f32 %v2164_v18, %v1836_v36 }
 0xce7   :  { %v1826_v39 = vmul.f32 0.5, %v1825_v37 }
 0xce8   :  { %2098 = vmatmul.msk.f32.vlgmr.msrb.gmra.mxu3 %vm86_vm1, %v1839_v38 }
 0xce9   :  { %v1827_v20 = vsub.f32 1.5, %v1826_v39 }
 0xceb   :  { %v1828_v21 = vmul.f32 %v2247_v33, %v1827_v20 }
 0xced   :  { %v1832_v40 = vsel %vm1831_vm6, %v2247_v33, %v1828_v21  ;;  %v2168_v33 = vld [vmem:[#allocation5 + $0x190] ss:$0 sm:$0xff] }
 0xcee   :  { %v1834_v41 = vmul.f32 %v1832_v40, %v1800_v2 }
 0xcf0   :  { %v1837_v10 = vmul.f32 %v2163_v30, %v1834_v41  ;;  %v2169_v41 = vld [vmem:[#allocation5 + $0x1b8] ss:$0 sm:$0xff] }
 0xcf2   :  { %v1840_v42 = vadd.f32 %v2164_v18, %v1837_v10 }
 0xcf4   :  { %2099 = vmatmul.msk.f32.gmra.mxu3 %vm86_vm1, %v1840_v42 }
 0xd6b   :  { %v1870_v46 = vpop.f32.mrf.mxu3 }
 0xd6c   :  { %v1871_v47 = vadd.f32 %v2165_v45, %v1870_v46 }
 0xd6e   :  { %v1876_v49 = vmax.f32 %v1871_v47, 0.0 }
 0xd70   :  { %2100 = vmatmul.msk.f32.vlgmr.msrb.gmra.mxu1 %vm86_vm1, %v1876_v49 }
 0xd77   :  { %v1873_v50 = vpop.f32.mrf.mxu3 }
 0xd78   :  { %v1874_v51 = vadd.f32 %v2165_v45, %v1873_v50 }
 0xd7a   :  { %v1877_v53 = vmax.f32 %v1874_v51, 0.0 }
 0xd7c   :  { %2101 = vmatmul.msk.f32.gmra.mxu1 %vm86_vm1, %v1877_v53 }
 0xded   :  { %v1907_v54 = vpop.f32.mrf.mxu1 }
 0xdee   :  { %v1908_v55 = vadd.f32 %v2166_v12, %v1907_v54 }
 0xdf0   :  { %v1913_v56 = vadd.f32 %v1908_v55, %v1839_v38 }
 0xdf2   :  { %v1917_v52 = vsel %vm86_vm1, %v1913_v56, 0.0 }
 0xdf3   :  { %1918 = vadd.xlane.f32.xlu1 %v1917_v52 }
 0xdf9   :  { %v1910_v57 = vpop.f32.mrf.mxu1 }
 0xdfa   :  { %v1911_v58 = vadd.f32 %v2166_v12, %v1910_v57 }
 0xdfc   :  { %v1914_v59 = vadd.f32 %v1911_v58, %v1840_v42 }
 0xdfe   :  { %v1920_v19 = vsel %vm86_vm1, %v1914_v59, 0.0 }
 0xdff   :  { %1921 = vadd.xlane.f32.xlu1 %v1920_v19 }
 0xe66   :  { %v1919_v60 = vpop.xlane.xlu1 %1918 }
 0xe67   :  { %v1923_v61 = vmul.f32 %v1919_v60, %v2521_v48 }
 0xe69   :  { %v1925_v62 = vsub.f32 %v1913_v56, %v1923_v61 }
 0xe6b   :  { %v1927_v63 = vmul.f32 %v1925_v62, %v1925_v62 }
 0xe6d   :  { %v1929_v0 = vsel %vm86_vm1, %v1927_v63, 0.0 }
 0xe6e   :  { %1930 = vadd.xlane.f32.xlu1 %v1929_v0 }
 0xe72   :  { %v1922_v35 = vpop.xlane.xlu1 %1921 }
 0xe73   :  { %v1924_v17 = vmul.f32 %v1922_v35, %v2521_v48 }
 0xe75   :  { %v1926_v1 = vsub.f32 %v1914_v59, %v1924_v17 }
 0xe77   :  { %v1928_v2 = vmul.f32 %v1926_v1, %v1926_v1 }
 0xe79   :  { %v1932_v3 = vsel %vm86_vm1, %v1928_v2, 0.0 }
 0xe7a   :  { %1933 = vadd.xlane.f32.xlu1 %v1932_v3 }
 0xee1   :  { %v1931_v8 = vpop.xlane.xlu1 %1930 }
 0xee2   :  { %v1935_v9 = vmul.f32 %v1931_v8, %v2521_v48 }
 0xee4   :  { %v1937_v11 = vadd.f32 1e-05, %v1935_v9 }
 0xee6   :  { %2248 = vrsqrt.f32 %v1937_v11  ;;  %vm1945_vm8 = vweird.f32 %v1937_v11 }
 0xeec   :  { %v2249_v13 = vpop.eup %2248 }
 0xeed   :  { %v1940_v14 = vmul.f32 %v2249_v13, %v1937_v11  ;;  %v1934_v16 = vpop.xlane.xlu1 %1933  ;;  %vm1946_vm7 = vweird.f32 %v2249_v13 }
 0xeee   :  { %v1936_v22 = vmul.f32 %v1934_v16, %v2521_v48  ;;  %vm1947_vm9 = vmor %vm1945_vm8, %vm1946_vm7 }
 0xeef   :  { %v1941_v24 = vmul.f32 %v2249_v13, %v1940_v14 }
 0xef0   :  { %v1938_v25 = vadd.f32 1e-05, %v1936_v22 }
 0xef1   :  { %v1942_v27 = vmul.f32 0.5, %v1941_v24 }
 0xef2   :  { %2250 = vrsqrt.f32 %v1938_v25  ;;  %vm1955_vm11 = vweird.f32 %v1938_v25 }
 0xef3   :  { %v1943_v5 = vsub.f32 1.5, %v1942_v27 }
 0xef5   :  { %v1944_v26 = vmul.f32 %v2249_v13, %v1943_v5 }
 0xef7   :  { %v1948_v29 = vsel %vm1947_vm9, %v2249_v13, %v1944_v26 }
 0xef8   :  { %v2251_v30 = vpop.eup %2250  ;;  %v1959_v31 = vmul.f32 %v1948_v29, %v1925_v62 }
 0xef9   :  { %v1950_v15 = vmul.f32 %v2251_v30, %v1938_v25  ;;  %vm1956_vm10 = vweird.f32 %v2251_v30 }
 0xefa   :  { %v1962_v18 = vmul.f32 %v2167_v28, %v1959_v31  ;;  %vm1957_vm12 = vmor %vm1955_vm11, %vm1956_vm10 }
 0xefb   :  { %v1951_v34 = vmul.f32 %v2251_v30, %v1950_v15 }
 0xefc   :  { %v1965_v36 = vadd.f32 %v2168_v33, %v1962_v18 }
 0xefd   :  { %v1952_v37 = vmul.f32 0.5, %v1951_v34 }
 0xefe   :  { %2102 = vmatmul.msk.f32.vlgmr.msrb.gmra.mxu0 %vm86_vm1, %v1965_v36 }
 0xeff   :  { %v1953_v48 = vsub.f32 1.5, %v1952_v37 }
 0xf01   :  { %v1954_v38 = vmul.f32 %v2251_v30, %v1953_v48 }
 0xf03   :  { %v1958_v39 = vsel %vm1957_vm12, %v2251_v30, %v1954_v38 }
 0xf04   :  { %v1960_v20 = vmul.f32 %v1958_v39, %v1926_v1 }
 0xf06   :  { %v1963_v21 = vmul.f32 %v2167_v28, %v1960_v20 }
 0xf08   :  { %v1966_v40 = vadd.f32 %v2168_v33, %v1963_v21 }
 0xf0a   :  { %2103 = vmatmul.msk.f32.gmra.mxu0 %vm86_vm1, %v1966_v40 }
 0xf7b   :  { %v1996_v10 = vpop.f32.mrf.mxu0 }
 0xf7c   :  { %v1997_v42 = vadd.f32 %v2169_v41, %v1996_v10 }
 0xf7e   :  { %2002 = vst [vmem:[#allocation7] sm:$0xff] %v1997_v42 }
 0xf87   :  { %v1999_v43 = vpop.f32.mrf.mxu0 }
 0xf88   :  { %v2000_v23 = vadd.f32 %v2169_v41, %v1999_v43 }
 0xf8a   :  { %2003 = vst [vmem:[#allocation7 + $0x8] sm:$0xff] %v2000_v23 }
 0xf8b   :  { %2016 = dma.vmem_to_hbm [thread:$0]  %s2009_s25, 256, %s2011_s28, [#allocation4], %s2331_s17, %s2331_s17, %s2332_s18  }
 0xf8c   :  { %2328 = dma.done.wait [#allocation4], 256  }
 0xf8d   :  { %2329 = vsyncadd [#allocation4], 4294967040 }
 0xf8e   :  { %2021 = vsyncpa [#allocation3], 1 }
 0xf8f   :  { %2022 = vsyncpa [#allocation6], 1 }
 0xf90   :  { %2023 = vsyncpa [#allocation4], 1 }

</bundles_post_ra>
